<compile_context>
chip_gen: v5e
topology: v5e:2x2
jax: 0.10.0
libtpu: 0.0.40
codegen_flags: <defaults>
</compile_context>

<pallas_src>
import functools
import math

import numpy as np
import jax
import jax.numpy as jnp
from jax.experimental import pallas as pl
from jax.experimental.pallas import tpu as pltpu


# Weight operands of the fused kernel, in call order (after src/tgt/pe).
_WEIGHT_ORDER = (
    "enc_w", "proj_w", "misc_vec",
    "e_wqkv", "e_wo", "e_l1w", "e_l2w", "e_vec",
    "d_wqkv", "d_wo", "d_cwq", "d_cwkv", "d_cwo", "d_l1w", "d_l2w", "d_vec",
)


# ------------------------------------------------------------------
# Fused transformer forward kernel (one grid step == one batch element)
# ------------------------------------------------------------------
def _fused_kernel(src_ref, tgt_ref, pe_ref,
                  enc_w_ref, proj_w_ref, misc_ref,
                  e_wqkv_ref, e_wo_ref, e_l1w_ref, e_l2w_ref, e_vec_ref,
                  d_wqkv_ref, d_wo_ref, d_cwq_ref, d_cwkv_ref, d_cwo_ref,
                  d_l1w_ref, d_l2w_ref, d_vec_ref,
                  out_ref, *, S, T, d, H, hid, nl, ntoken):
    f32 = jnp.float32
    dh = d // H

    def mm(a, b):
        return jnp.dot(a, b, preferred_element_type=f32)

    def mm_nt(a, b):  # a @ b.T (contract last dims), no explicit transpose
        return jax.lax.dot_general(a, b, (((1,), (1,)), ((), ())),
                                   preferred_element_type=f32)

    def layer_norm(x, g, b):
        mu = jnp.mean(x, axis=-1, keepdims=True)
        var = jnp.mean(jnp.square(x - mu), axis=-1, keepdims=True)
        return (x - mu) * jax.lax.rsqrt(var + 1e-5) * g + b

    def softmax(s):
        m = jnp.max(s, axis=-1, keepdims=True)
        p = jnp.exp(s - m)
        return p / jnp.sum(p, axis=-1, keepdims=True)   # exact: rows are tiny

    def mha(q, k, v, wo, bo, mask):
        """q:(Lq,d), k/v:(Lk,d) — already projected (bias added, scale folded
        into q).  Per-head scores via static lane slices; ONE out-projection
        on the concatenated contexts."""
        ctx = []
        for h in range(H):                                  # static head loop
            lo, hi = h * dh, (h + 1) * dh
            s = mm_nt(q[:, lo:hi], k[:, lo:hi])             # (Lq, Lk)
            if mask is not None:
                s = s + mask
            ctx.append(mm(softmax(s), v[:, lo:hi]))         # (Lq, dh)
        return mm(jnp.concatenate(ctx, axis=-1), wo) + bo   # (Lq, d)

    # ---- unpack small packed operands -------------------------------------
    pe = pe_ref[...]                       # (max(S,T), d)
    misc = misc_ref[...]                   # (6, LW)
    enc_b = misc[0:1, :d]                  # sqrt(ninp) folded in
    proj_b = misc[1:2, :ntoken]
    encn_g, encn_b = misc[2:3, :d], misc[3:4, :d]
    decn_g, decn_b = misc[4:5, :d], misc[5:6, :d]
    enc_w = enc_w_ref[...]                 # (nj, d), sqrt(ninp) folded in

    # TODO(synk): nn.Dropout(p=0.5) layers are identity here (training-mode RNG
    # cannot be reproduced); everything else follows the training branch.

    # ---------------- encoder ----------------
    x0 = mm(src_ref[0], enc_w) + enc_b + pe[:S]            # (S, d)

    def enc_layer(l, x):
        vec = e_vec_ref[l]                                  # (8, LW)
        bqkv, bo = vec[0:1, :3 * d], vec[1:2, :d]
        l1b, l2b = vec[2:3, :hid], vec[3:4, :d]
        n1g, n1b = vec[4:5, :d], vec[5:6, :d]
        n2g, n2b = vec[6:7, :d], vec[7:8, :d]
        qkv = mm(x, e_wqkv_ref[l]) + bqkv                   # fused Q/K/V proj
        a = mha(qkv[:, :d], qkv[:, d:2 * d], qkv[:, 2 * d:],
                e_wo_ref[l], bo, None)
        x = layer_norm(x + a, n1g, n1b)
        f = mm(jnp.maximum(mm(x, e_l1w_ref[l]) + l1b, 0.0), e_l2w_ref[l]) + l2b
        return layer_norm(x + f, n2g, n2b)

    memory = layer_norm(jax.lax.fori_loop(0, nl, enc_layer, x0),
                        encn_g, encn_b)                     # (S, d)

    # ---------------- decoder (training branch) ----------------
    rows = jax.lax.broadcasted_iota(jnp.int32, (T, T), 0)
    cols = jax.lax.broadcasted_iota(jnp.int32, (T, T), 1)
    # -1e30 instead of -inf: identical softmax (diagonal is always unmasked)
    causal = jnp.where(cols <= rows, 0.0, -1e30).astype(f32)

    y0 = mm(tgt_ref[0], enc_w) + enc_b + pe[:T]             # (T, d)

    def dec_layer(l, y):
        vec = d_vec_ref[l]                                  # (13, LW)
        s_bqkv, s_bo = vec[0:1, :3 * d], vec[1:2, :d]
        c_bq, c_bkv, c_bo = vec[2:3, :d], vec[3:4, :2 * d], vec[4:5, :d]
        l1b, l2b = vec[5:6, :hid], vec[6:7, :d]
        n1g, n1b = vec[7:8, :d], vec[8:9, :d]
        n2g, n2b = vec[9:10, :d], vec[10:11, :d]
        n3g, n3b = vec[11:12, :d], vec[12:13, :d]
        # self-attention (fused QKV) with causal mask
        qkv = mm(y, d_wqkv_ref[l]) + s_bqkv
        a = mha(qkv[:, :d], qkv[:, d:2 * d], qkv[:, 2 * d:],
                d_wo_ref[l], s_bo, causal)
        y = layer_norm(y + a, n1g, n1b)
        # cross-attention: Q from decoder, fused K/V from encoder memory
        q = mm(y, d_cwq_ref[l]) + c_bq
        kv = mm(memory, d_cwkv_ref[l]) + c_bkv
        a = mha(q, kv[:, :d], kv[:, d:], d_cwo_ref[l], c_bo, None)
        y = layer_norm(y + a, n2g, n2b)
        # feed-forward
        f = mm(jnp.maximum(mm(y, d_l1w_ref[l]) + l1b, 0.0), d_l2w_ref[l]) + l2b
        return layer_norm(y + f, n3g, n3b)

    y = layer_norm(jax.lax.fori_loop(0, nl, dec_layer, y0), decn_g, decn_b)
    out_ref[0] = mm(y, proj_w_ref[...]) + proj_b            # (T, ntoken)


def _rough_cost(B, S, T, d, H, hid, nl, nj, ntoken, n_bytes):
    enc = 2 * S * nj * d + nl * (2 * S * d * 3 * d + 4 * S * S * d
                                 + 2 * S * d * d + 4 * S * d * hid)
    dec = 2 * T * nj * d + nl * (2 * T * d * 3 * d + 4 * T * T * d + 2 * T * d * d
                                 + 2 * T * d * d + 2 * S * d * 2 * d
                                 + 4 * T * S * d + 2 * T * d * d
                                 + 4 * T * d * hid)
    flops = B * (enc + dec + 2 * T * d * ntoken)
    trans = B * H * nl * (S * S + T * T + T * S)
    return pl.CostEstimate(flops=int(flops), transcendentals=int(trans),
                           bytes_accessed=int(n_bytes))


def _batch_spec(shape):
    nd = len(shape)
    return pl.BlockSpec((1,) + tuple(shape[1:]),
                        lambda b, _nd=nd: (b,) + (0,) * (_nd - 1))


def _const_spec(shape):
    nd = len(shape)
    return pl.BlockSpec(tuple(shape), lambda b, _nd=nd: (0,) * _nd)


# ------------------------------------------------------------------
# Full forward (wrapper: layout plumbing + one pallas_call)
# ------------------------------------------------------------------
def transformer_model2_forward(packed, src, tgt, cfg):
    nj, rep, d, H = cfg["num_joints"], cfg["rep_size"], cfg["ninp"], cfg["num_heads"]
    nl, hid, ntoken = cfg["num_layers"], cfg["hidden_dim"], cfg["ntoken"]
    B, S, _ = src.shape
    T = tgt.shape[1]
    P = max(S, T)

    # training branch: teacher-forced, tgt shifted by the last src frame
    src_sb = jnp.transpose(src, (1, 0, 2))               # (S, B, ntoken)
    tgt_sb = jnp.transpose(tgt, (1, 0, 2))               # (T, B, ntoken)
    tgt_shift = jnp.concatenate([src_sb[-1:], tgt_sb[:-1]], axis=0)

    def conv_rows(x_sb, L):
        pre = x_sb.reshape(B, nj, rep * L)                # torch .reshape
        return (pre.reshape(B, nj, L, rep)
                   .transpose(0, 2, 1, 3)
                   .reshape(B * L, nj * rep))             # im2col (stride == kernel)

    # Conv1d "compression" == plain matmul; tiny -> plain XLA dot (fuses free).
    rows = jnp.concatenate([conv_rows(src_sb, S), conv_rows(tgt_shift, T)], axis=0)
    comp = jnp.dot(rows, packed["comp_wt"]) + packed["comp_b"]

    def post_comp(yy, L):
        c = yy.reshape(B, L, nj).transpose(0, 2, 1)       # conv output (B, nj, L)
        post = c.reshape(L, B, nj)                        # torch .view(L, B, nj)
        return post.transpose(1, 0, 2)                    # (B, L, nj) batch-major

    src_post = post_comp(comp[:B * S], S)                 # (B, S, nj)
    tgt_post = post_comp(comp[B * S:], T)                 # (B, T, nj)
    pe = packed["pe"][:P]                                 # (P, d)

    weight_ops = [packed[k] for k in _WEIGHT_ORDER]
    inputs = [src_post, tgt_post, pe] + weight_ops
    n_bytes = sum(int(np.prod(a.shape)) * 4 for a in inputs) + B * T * ntoken * 4

    kern = functools.partial(_fused_kernel, S=S, T=T, d=d, H=H, hid=hid,
                             nl=nl, ntoken=ntoken)

    in_specs = ([_batch_spec(src_post.shape), _batch_spec(tgt_post.shape),
                 _const_spec(pe.shape)]
                + [_const_spec(w.shape) for w in weight_ops])

    out = pl.pallas_call(
        kern,
        out_shape=jax.ShapeDtypeStruct((B, T, ntoken), jnp.float32),
        grid=(B,),
        in_specs=in_specs,
        out_specs=pl.BlockSpec((1, T, ntoken), lambda b: (b, 0, 0)),
        compiler_params=pltpu.CompilerParams(
            dimension_semantics=("parallel",),        # batch across TCs on v7x
            vmem_limit_bytes=32 * 1024 * 1024),
        cost_estimate=_rough_cost(B, S, T, d, H, hid, nl, nj, ntoken, n_bytes),
    )(*inputs)

    return out                                            # (B, T, ntoken)


# ------------------------------------------------------------------
# Positional encoding + deterministic torch-style parameters + packing
# ------------------------------------------------------------------
def positional_encoding(max_len, d):
    pos = np.arange(max_len, dtype=np.float32)[:, None]
    div = np.exp(np.arange(0, d, 2, dtype=np.float32) * (-np.log(10000.0) / d))
    pe = np.zeros((max_len, d), np.float32)
    pe[:, 0::2] = np.sin(pos * div)
    pe[:, 1::2] = np.cos(pos * div)
    return jnp.asarray(pe)                                # (max_len, d)


class KeyGen:
    def __init__(self, key):
        self.key = key

    def __call__(self):
        self.key, sub = jax.random.split(self.key)
        return sub


def _xavier(key, shape):
    fan_out, fan_in = shape[0], int(np.prod(shape[1:]))
    a = math.sqrt(6.0 / (fan_in + fan_out))
    return jax.random.uniform(key, shape, jnp.float32, -a, a)


def _bias(key, n):
    return jax.random.uniform(key, (n,), jnp.float32, -0.01, 0.01)


def init_params(key, cfg):
    """Torch-layout parameters (in_proj_weight (3d,d), out_proj (d,d), ...)."""
    kg = KeyGen(key)
    nj, rep, d = cfg["num_joints"], cfg["rep_size"], cfg["ninp"]
    hid, nl, ntoken = cfg["hidden_dim"], cfg["num_layers"], cfg["ntoken"]
    f32 = jnp.float32

    def mha():
        return dict(in_w=_xavier(kg(), (3 * d, d)), in_b=_bias(kg(), 3 * d),
                    out_w=_xavier(kg(), (d, d)), out_b=_bias(kg(), d))

    def ffn():
        return dict(l1w=_xavier(kg(), (hid, d)), l1b=_bias(kg(), hid),
                    l2w=_xavier(kg(), (d, hid)), l2b=_bias(kg(), d))

    def norm():
        return dict(g=jnp.ones((d,), f32), b=jnp.zeros((d,), f32))

    enc_layers = [dict(attn=mha(), ffn=ffn(), n1=norm(), n2=norm())
                  for _ in range(nl)]
    dec_layers = [{"self": mha(), "cross": mha(), "ffn": ffn(),
                   "n1": norm(), "n2": norm(), "n3": norm()} for _ in range(nl)]

    return dict(
        comp_w=_xavier(kg(), (nj, nj, rep)), comp_b=_bias(kg(), nj),
        enc_w=_xavier(kg(), (d, nj)), enc_b=_bias(kg(), d),
        proj_w=_xavier(kg(), (ntoken, d)), proj_b=_bias(kg(), ntoken),
        enc_layers=enc_layers, dec_layers=dec_layers,
        encn=norm(), decn=norm(),
        pe=positional_encoding(256, d),   # first rows identical to max_len=5000
    )


def pack_params(p, cfg):
    """One-time host-side packing: fused QKV weights (attention scale folded
    into Q), per-type per-layer stacks, and all biases / norm params packed
    into a few (rows, 128)-lane slabs."""
    nj, rep, d = cfg["num_joints"], cfg["rep_size"], cfg["ninp"]
    H, hid, ntoken = cfg["num_heads"], cfg["hidden_dim"], cfg["ntoken"]
    dh = d // H
    scale = 1.0 / math.sqrt(dh)
    sinp = math.sqrt(d)
    LW = int(np.ceil(max(3 * d, hid, ntoken, d) / 128.0)) * 128

    def row(v):
        v = jnp.asarray(v, jnp.float32).reshape(-1)
        return jnp.pad(v, (0, LW - v.shape[0]))

    def qkv_w(attn):                     # (d, 3d), scale folded into Q block
        w = attn["in_w"].T
        return jnp.concatenate([w[:, :d] * scale, w[:, d:]], axis=1)

    def qkv_b(attn):
        b = attn["in_b"]
        return jnp.concatenate([b[:d] * scale, b[d:]])

    enc, dec = p["enc_layers"], p["dec_layers"]
    e_vec = jnp.stack([jnp.stack([
        row(qkv_b(l["attn"])), row(l["attn"]["out_b"]),
        row(l["ffn"]["l1b"]), row(l["ffn"]["l2b"]),
        row(l["n1"]["g"]), row(l["n1"]["b"]),
        row(l["n2"]["g"]), row(l["n2"]["b"])]) for l in enc])
    d_vec = jnp.stack([jnp.stack([
        row(qkv_b(l["self"])), row(l["self"]["out_b"]),
        row(l["cross"]["in_b"][:d] * scale), row(l["cross"]["in_b"][d:]),
        row(l["cross"]["out_b"]),
        row(l["ffn"]["l1b"]), row(l["ffn"]["l2b"]),
        row(l["n1"]["g"]), row(l["n1"]["b"]),
        row(l["n2"]["g"]), row(l["n2"]["b"]),
        row(l["n3"]["g"]), row(l["n3"]["b"])]) for l in dec])
    misc_vec = jnp.stack([
        row(p["enc_b"] * sinp), row(p["proj_b"]),
        row(p["encn"]["g"]), row(p["encn"]["b"]),
        row(p["decn"]["g"]), row(p["decn"]["b"])])

    return dict(
        comp_wt=p["comp_w"].reshape(nj, nj * rep).T,       # (nj*rep, nj)
        comp_b=p["comp_b"].reshape(1, nj),
        enc_w=p["enc_w"].T * sinp,                         # (nj, d), sqrt(ninp) folded
        proj_w=p["proj_w"].T,                              # (d, ntoken)
        misc_vec=misc_vec, pe=p["pe"],
        e_wqkv=jnp.stack([qkv_w(l["attn"]) for l in enc]),
        e_wo=jnp.stack([l["attn"]["out_w"].T for l in enc]),
        e_l1w=jnp.stack([l["ffn"]["l1w"].T for l in enc]),
        e_l2w=jnp.stack([l["ffn"]["l2w"].T for l in enc]),
        e_vec=e_vec,
        d_wqkv=jnp.stack([qkv_w(l["self"]) for l in dec]),
        d_wo=jnp.stack([l["self"]["out_w"].T for l in dec]),
        d_cwq=jnp.stack([l["cross"]["in_w"][:d].T * scale for l in dec]),
        d_cwkv=jnp.stack([l["cross"]["in_w"][d:].T for l in dec]),
        d_cwo=jnp.stack([l["cross"]["out_w"].T for l in dec]),
        d_l1w=jnp.stack([l["ffn"]["l1w"].T for l in dec]),
        d_l2w=jnp.stack([l["ffn"]["l2w"].T for l in dec]),
        d_vec=d_vec,
    )


# ------------------------------------------------------------------
if __name__ == "__main__":
    cfg = dict(ntoken=48, ninp=32, num_heads=4, hidden_dim=64,
               num_layers=2, num_joints=24)
    cfg["rep_size"] = cfg["ntoken"] // cfg["num_joints"]   # = 2

    key = jax.random.PRNGKey(0)
    kp, kx, ky = jax.random.split(key, 3)
    params = init_params(kp, cfg)
    packed = pack_params(params, cfg)

    B, S, T = 2, 8, 8
    src = jax.random.normal(kx, (B, S, cfg["ntoken"]), jnp.float32)
    tgt = jax.random.normal(ky, (B, T, cfg["ntoken"]), jnp.float32)

    fwd = jax.jit(functools.partial(transformer_model2_forward, cfg=cfg))
    out = jax.block_until_ready(fwd(packed, src, tgt))

    assert out.shape == (B, T, cfg["ntoken"]), out.shape
    assert bool(jnp.all(jnp.isfinite(out)))
    print("KERNEL_OK")
</pallas_src>

<mosaic_0001>
module attributes {stable_mosaic.version = 11 : i64} {
  func.func @_fused_kernel(%arg0: i32, %arg1: memref<1x8x24xf32, #tpu.memory_space<vmem>>, %arg2: memref<1x8x24xf32, #tpu.memory_space<vmem>>, %arg3: memref<8x32xf32, #tpu.memory_space<vmem>>, %arg4: memref<24x32xf32, #tpu.memory_space<vmem>>, %arg5: memref<32x48xf32, #tpu.memory_space<vmem>>, %arg6: memref<6x128xf32, #tpu.memory_space<vmem>>, %arg7: memref<2x32x96xf32, #tpu.memory_space<vmem>>, %arg8: memref<2x32x32xf32, #tpu.memory_space<vmem>>, %arg9: memref<2x32x64xf32, #tpu.memory_space<vmem>>, %arg10: memref<2x64x32xf32, #tpu.memory_space<vmem>>, %arg11: memref<2x8x128xf32, #tpu.memory_space<vmem>>, %arg12: memref<2x32x96xf32, #tpu.memory_space<vmem>>, %arg13: memref<2x32x32xf32, #tpu.memory_space<vmem>>, %arg14: memref<2x32x32xf32, #tpu.memory_space<vmem>>, %arg15: memref<2x32x64xf32, #tpu.memory_space<vmem>>, %arg16: memref<2x32x32xf32, #tpu.memory_space<vmem>>, %arg17: memref<2x32x64xf32, #tpu.memory_space<vmem>>, %arg18: memref<2x64x32xf32, #tpu.memory_space<vmem>>, %arg19: memref<2x13x128xf32, #tpu.memory_space<vmem>>, %arg20: memref<1x8x48xf32, #tpu.memory_space<vmem>>) attributes {dimension_semantics = [#tpu.dimension_semantics<parallel>], iteration_bounds = array<i64: 2>, scalar_prefetch = 0 : i64, scratch_operands = 0 : i64, tpu.core_type = #tpu.core_type<tc>, window_params = [{transform_indices = @transform_0, window_bounds = array<i64: 1, 8, 24>}, {transform_indices = @transform_1, window_bounds = array<i64: 1, 8, 24>}, {pipeline_mode = #tpu.pipeline_mode<synchronous>, transform_indices = @transform_2, window_bounds = array<i64: 8, 32>}, {pipeline_mode = #tpu.pipeline_mode<synchronous>, transform_indices = @transform_3, window_bounds = array<i64: 24, 32>}, {pipeline_mode = #tpu.pipeline_mode<synchronous>, transform_indices = @transform_4, window_bounds = array<i64: 32, 48>}, {pipeline_mode = #tpu.pipeline_mode<synchronous>, transform_indices = @transform_5, window_bounds = array<i64: 6, 128>}, {pipeline_mode = #tpu.pipeline_mode<synchronous>, transform_indices = @transform_6, window_bounds = array<i64: 2, 32, 96>}, {pipeline_mode = #tpu.pipeline_mode<synchronous>, transform_indices = @transform_7, window_bounds = array<i64: 2, 32, 32>}, {pipeline_mode = #tpu.pipeline_mode<synchronous>, transform_indices = @transform_8, window_bounds = array<i64: 2, 32, 64>}, {pipeline_mode = #tpu.pipeline_mode<synchronous>, transform_indices = @transform_9, window_bounds = array<i64: 2, 64, 32>}, {pipeline_mode = #tpu.pipeline_mode<synchronous>, transform_indices = @transform_10, window_bounds = array<i64: 2, 8, 128>}, {pipeline_mode = #tpu.pipeline_mode<synchronous>, transform_indices = @transform_11, window_bounds = array<i64: 2, 32, 96>}, {pipeline_mode = #tpu.pipeline_mode<synchronous>, transform_indices = @transform_12, window_bounds = array<i64: 2, 32, 32>}, {pipeline_mode = #tpu.pipeline_mode<synchronous>, transform_indices = @transform_13, window_bounds = array<i64: 2, 32, 32>}, {pipeline_mode = #tpu.pipeline_mode<synchronous>, transform_indices = @transform_14, window_bounds = array<i64: 2, 32, 64>}, {pipeline_mode = #tpu.pipeline_mode<synchronous>, transform_indices = @transform_15, window_bounds = array<i64: 2, 32, 32>}, {pipeline_mode = #tpu.pipeline_mode<synchronous>, transform_indices = @transform_16, window_bounds = array<i64: 2, 32, 64>}, {pipeline_mode = #tpu.pipeline_mode<synchronous>, transform_indices = @transform_17, window_bounds = array<i64: 2, 64, 32>}, {pipeline_mode = #tpu.pipeline_mode<synchronous>, transform_indices = @transform_18, window_bounds = array<i64: 2, 13, 128>}, {transform_indices = @transform_19, window_bounds = array<i64: 1, 8, 48>}]} {
    %c0 = arith.constant 0 : index
    %c0_0 = arith.constant 0 : index
    %0 = vector.load %arg3[%c0, %c0_0] : memref<8x32xf32, #tpu.memory_space<vmem>>, vector<8x32xf32>
    %c0_1 = arith.constant 0 : index
    %c0_2 = arith.constant 0 : index
    %1 = vector.load %arg6[%c0_1, %c0_2] : memref<6x128xf32, #tpu.memory_space<vmem>>, vector<6x128xf32>
    %2 = vector.extract_strided_slice %1 {offsets = [0, 0], sizes = [1, 32], strides = [1, 1]} : vector<6x128xf32> to vector<1x32xf32>
    %3 = vector.extract_strided_slice %1 {offsets = [1, 0], sizes = [1, 48], strides = [1, 1]} : vector<6x128xf32> to vector<1x48xf32>
    %4 = vector.extract_strided_slice %1 {offsets = [2, 0], sizes = [1, 32], strides = [1, 1]} : vector<6x128xf32> to vector<1x32xf32>
    %5 = vector.extract_strided_slice %1 {offsets = [3, 0], sizes = [1, 32], strides = [1, 1]} : vector<6x128xf32> to vector<1x32xf32>
    %6 = vector.extract_strided_slice %1 {offsets = [4, 0], sizes = [1, 32], strides = [1, 1]} : vector<6x128xf32> to vector<1x32xf32>
    %7 = vector.extract_strided_slice %1 {offsets = [5, 0], sizes = [1, 32], strides = [1, 1]} : vector<6x128xf32> to vector<1x32xf32>
    %c0_3 = arith.constant 0 : index
    %c0_4 = arith.constant 0 : index
    %8 = vector.load %arg4[%c0_3, %c0_4] : memref<24x32xf32, #tpu.memory_space<vmem>>, vector<24x32xf32>
    %c0_5 = arith.constant 0 : index
    %c0_6 = arith.constant 0 : index
    %c0_7 = arith.constant 0 : index
    %9 = vector.load %arg1[%c0_5, %c0_6, %c0_7] : memref<1x8x24xf32, #tpu.memory_space<vmem>>, vector<1x8x24xf32>
    %10 = vector.shape_cast %9 : vector<1x8x24xf32> to vector<8x24xf32>
    %cst = arith.constant dense<0.000000e+00> : vector<8x32xf32>
    %11 = tpu.matmul %10, %8, %cst {dimension_numbers = #tpu.dot_dimension_numbers<[1], [0], [0], [1], [0, 0, 1, 1], [], []>} : vector<8x24xf32>, vector<24x32xf32>, vector<8x32xf32> -> vector<8x32xf32>
    %12 = vector.broadcast %2 : vector<1x32xf32> to vector<8x32xf32>
    %13 = arith.addf %11, %12 : vector<8x32xf32>
    %14 = arith.addf %13, %0 : vector<8x32xf32>
    %c0_i32 = arith.constant 0 : i32
    %c2_i32 = arith.constant 2 : i32
    %15 = arith.addi %c0_i32, %c2_i32 : i32
    %c1_i32 = arith.constant 1 : i32
    %16 = scf.for %arg21 = %c0_i32 to %15 step %c1_i32 iter_args(%arg22 = %14) -> (vector<8x32xf32>)  : i32 {
      %82 = arith.index_cast %arg21 : i32 to index
      %c0_35 = arith.constant 0 : index
      %c0_36 = arith.constant 0 : index
      %83 = vector.load %arg11[%82, %c0_35, %c0_36] : memref<2x8x128xf32, #tpu.memory_space<vmem>>, vector<1x8x128xf32>
      %84 = vector.shape_cast %83 : vector<1x8x128xf32> to vector<8x128xf32>
      %85 = vector.extract_strided_slice %84 {offsets = [0, 0], sizes = [1, 96], strides = [1, 1]} : vector<8x128xf32> to vector<1x96xf32>
      %86 = vector.extract_strided_slice %84 {offsets = [1, 0], sizes = [1, 32], strides = [1, 1]} : vector<8x128xf32> to vector<1x32xf32>
      %87 = vector.extract_strided_slice %84 {offsets = [2, 0], sizes = [1, 64], strides = [1, 1]} : vector<8x128xf32> to vector<1x64xf32>
      %88 = vector.extract_strided_slice %84 {offsets = [3, 0], sizes = [1, 32], strides = [1, 1]} : vector<8x128xf32> to vector<1x32xf32>
      %89 = vector.extract_strided_slice %84 {offsets = [4, 0], sizes = [1, 32], strides = [1, 1]} : vector<8x128xf32> to vector<1x32xf32>
      %90 = vector.extract_strided_slice %84 {offsets = [5, 0], sizes = [1, 32], strides = [1, 1]} : vector<8x128xf32> to vector<1x32xf32>
      %91 = vector.extract_strided_slice %84 {offsets = [6, 0], sizes = [1, 32], strides = [1, 1]} : vector<8x128xf32> to vector<1x32xf32>
      %92 = vector.extract_strided_slice %84 {offsets = [7, 0], sizes = [1, 32], strides = [1, 1]} : vector<8x128xf32> to vector<1x32xf32>
      %93 = arith.index_cast %arg21 : i32 to index
      %c0_37 = arith.constant 0 : index
      %c0_38 = arith.constant 0 : index
      %94 = vector.load %arg7[%93, %c0_37, %c0_38] : memref<2x32x96xf32, #tpu.memory_space<vmem>>, vector<1x32x96xf32>
      %95 = vector.shape_cast %94 : vector<1x32x96xf32> to vector<32x96xf32>
      %cst_39 = arith.constant dense<0.000000e+00> : vector<8x96xf32>
      %96 = tpu.matmul %arg22, %95, %cst_39 {dimension_numbers = #tpu.dot_dimension_numbers<[1], [0], [0], [1], [0, 0, 1, 1], [], []>} : vector<8x32xf32>, vector<32x96xf32>, vector<8x96xf32> -> vector<8x96xf32>
      %97 = vector.broadcast %85 : vector<1x96xf32> to vector<8x96xf32>
      %98 = arith.addf %96, %97 : vector<8x96xf32>
      %99 = vector.extract_strided_slice %98 {offsets = [0, 0], sizes = [8, 32], strides = [1, 1]} : vector<8x96xf32> to vector<8x32xf32>
      %100 = vector.extract_strided_slice %98 {offsets = [0, 32], sizes = [8, 32], strides = [1, 1]} : vector<8x96xf32> to vector<8x32xf32>
      %101 = vector.extract_strided_slice %98 {offsets = [0, 64], sizes = [8, 32], strides = [1, 1]} : vector<8x96xf32> to vector<8x32xf32>
      %102 = arith.index_cast %arg21 : i32 to index
      %c0_40 = arith.constant 0 : index
      %c0_41 = arith.constant 0 : index
      %103 = vector.load %arg8[%102, %c0_40, %c0_41] : memref<2x32x32xf32, #tpu.memory_space<vmem>>, vector<1x32x32xf32>
      %104 = vector.shape_cast %103 : vector<1x32x32xf32> to vector<32x32xf32>
      %105 = vector.extract_strided_slice %99 {offsets = [0, 0], sizes = [8, 8], strides = [1, 1]} : vector<8x32xf32> to vector<8x8xf32>
      %106 = vector.extract_strided_slice %100 {offsets = [0, 0], sizes = [8, 8], strides = [1, 1]} : vector<8x32xf32> to vector<8x8xf32>
      %cst_42 = arith.constant dense<0.000000e+00> : vector<8x8xf32>
      %107 = tpu.matmul %105, %106, %cst_42 {dimension_numbers = #tpu.dot_dimension_numbers<[1], [1], [0], [0], [0, 0, 1, 0], [], []>} : vector<8x8xf32>, vector<8x8xf32>, vector<8x8xf32> -> vector<8x8xf32>
      %cst_43 = arith.constant dense<0xFF800000> : vector<8xf32>
      %108 = vector.multi_reduction <maximumf>, %107, %cst_43 [1] : vector<8x8xf32> to vector<8xf32>
      %109 = vector.shape_cast %108 : vector<8xf32> to vector<8x1xf32>
      %110 = vector.broadcast %109 : vector<8x1xf32> to vector<8x8xf32>
      %111 = arith.subf %107, %110 : vector<8x8xf32>
      %112 = math.exp %111 : vector<8x8xf32>
      %cst_44 = arith.constant dense<0.000000e+00> : vector<8xf32>
      %113 = vector.multi_reduction <add>, %112, %cst_44 [1] : vector<8x8xf32> to vector<8xf32>
      %114 = vector.shape_cast %113 : vector<8xf32> to vector<8x1xf32>
      %115 = vector.broadcast %114 : vector<8x1xf32> to vector<8x8xf32>
      %116 = arith.divf %112, %115 : vector<8x8xf32>
      %117 = vector.extract_strided_slice %101 {offsets = [0, 0], sizes = [8, 8], strides = [1, 1]} : vector<8x32xf32> to vector<8x8xf32>
      %cst_45 = arith.constant dense<0.000000e+00> : vector<8x8xf32>
      %118 = tpu.matmul %116, %117, %cst_45 {dimension_numbers = #tpu.dot_dimension_numbers<[1], [0], [0], [1], [0, 0, 1, 1], [], []>} : vector<8x8xf32>, vector<8x8xf32>, vector<8x8xf32> -> vector<8x8xf32>
      %119 = vector.extract_strided_slice %99 {offsets = [0, 8], sizes = [8, 8], strides = [1, 1]} : vector<8x32xf32> to vector<8x8xf32>
      %120 = vector.extract_strided_slice %100 {offsets = [0, 8], sizes = [8, 8], strides = [1, 1]} : vector<8x32xf32> to vector<8x8xf32>
      %cst_46 = arith.constant dense<0.000000e+00> : vector<8x8xf32>
      %121 = tpu.matmul %119, %120, %cst_46 {dimension_numbers = #tpu.dot_dimension_numbers<[1], [1], [0], [0], [0, 0, 1, 0], [], []>} : vector<8x8xf32>, vector<8x8xf32>, vector<8x8xf32> -> vector<8x8xf32>
      %cst_47 = arith.constant dense<0xFF800000> : vector<8xf32>
      %122 = vector.multi_reduction <maximumf>, %121, %cst_47 [1] : vector<8x8xf32> to vector<8xf32>
      %123 = vector.shape_cast %122 : vector<8xf32> to vector<8x1xf32>
      %124 = vector.broadcast %123 : vector<8x1xf32> to vector<8x8xf32>
      %125 = arith.subf %121, %124 : vector<8x8xf32>
      %126 = math.exp %125 : vector<8x8xf32>
      %cst_48 = arith.constant dense<0.000000e+00> : vector<8xf32>
      %127 = vector.multi_reduction <add>, %126, %cst_48 [1] : vector<8x8xf32> to vector<8xf32>
      %128 = vector.shape_cast %127 : vector<8xf32> to vector<8x1xf32>
      %129 = vector.broadcast %128 : vector<8x1xf32> to vector<8x8xf32>
      %130 = arith.divf %126, %129 : vector<8x8xf32>
      %131 = vector.extract_strided_slice %101 {offsets = [0, 8], sizes = [8, 8], strides = [1, 1]} : vector<8x32xf32> to vector<8x8xf32>
      %cst_49 = arith.constant dense<0.000000e+00> : vector<8x8xf32>
      %132 = tpu.matmul %130, %131, %cst_49 {dimension_numbers = #tpu.dot_dimension_numbers<[1], [0], [0], [1], [0, 0, 1, 1], [], []>} : vector<8x8xf32>, vector<8x8xf32>, vector<8x8xf32> -> vector<8x8xf32>
      %133 = vector.extract_strided_slice %99 {offsets = [0, 16], sizes = [8, 8], strides = [1, 1]} : vector<8x32xf32> to vector<8x8xf32>
      %134 = vector.extract_strided_slice %100 {offsets = [0, 16], sizes = [8, 8], strides = [1, 1]} : vector<8x32xf32> to vector<8x8xf32>
      %cst_50 = arith.constant dense<0.000000e+00> : vector<8x8xf32>
      %135 = tpu.matmul %133, %134, %cst_50 {dimension_numbers = #tpu.dot_dimension_numbers<[1], [1], [0], [0], [0, 0, 1, 0], [], []>} : vector<8x8xf32>, vector<8x8xf32>, vector<8x8xf32> -> vector<8x8xf32>
      %cst_51 = arith.constant dense<0xFF800000> : vector<8xf32>
      %136 = vector.multi_reduction <maximumf>, %135, %cst_51 [1] : vector<8x8xf32> to vector<8xf32>
      %137 = vector.shape_cast %136 : vector<8xf32> to vector<8x1xf32>
      %138 = vector.broadcast %137 : vector<8x1xf32> to vector<8x8xf32>
      %139 = arith.subf %135, %138 : vector<8x8xf32>
      %140 = math.exp %139 : vector<8x8xf32>
      %cst_52 = arith.constant dense<0.000000e+00> : vector<8xf32>
      %141 = vector.multi_reduction <add>, %140, %cst_52 [1] : vector<8x8xf32> to vector<8xf32>
      %142 = vector.shape_cast %141 : vector<8xf32> to vector<8x1xf32>
      %143 = vector.broadcast %142 : vector<8x1xf32> to vector<8x8xf32>
      %144 = arith.divf %140, %143 : vector<8x8xf32>
      %145 = vector.extract_strided_slice %101 {offsets = [0, 16], sizes = [8, 8], strides = [1, 1]} : vector<8x32xf32> to vector<8x8xf32>
      %cst_53 = arith.constant dense<0.000000e+00> : vector<8x8xf32>
      %146 = tpu.matmul %144, %145, %cst_53 {dimension_numbers = #tpu.dot_dimension_numbers<[1], [0], [0], [1], [0, 0, 1, 1], [], []>} : vector<8x8xf32>, vector<8x8xf32>, vector<8x8xf32> -> vector<8x8xf32>
      %147 = vector.extract_strided_slice %99 {offsets = [0, 24], sizes = [8, 8], strides = [1, 1]} : vector<8x32xf32> to vector<8x8xf32>
      %148 = vector.extract_strided_slice %100 {offsets = [0, 24], sizes = [8, 8], strides = [1, 1]} : vector<8x32xf32> to vector<8x8xf32>
      %cst_54 = arith.constant dense<0.000000e+00> : vector<8x8xf32>
      %149 = tpu.matmul %147, %148, %cst_54 {dimension_numbers = #tpu.dot_dimension_numbers<[1], [1], [0], [0], [0, 0, 1, 0], [], []>} : vector<8x8xf32>, vector<8x8xf32>, vector<8x8xf32> -> vector<8x8xf32>
      %cst_55 = arith.constant dense<0xFF800000> : vector<8xf32>
      %150 = vector.multi_reduction <maximumf>, %149, %cst_55 [1] : vector<8x8xf32> to vector<8xf32>
      %151 = vector.shape_cast %150 : vector<8xf32> to vector<8x1xf32>
      %152 = vector.broadcast %151 : vector<8x1xf32> to vector<8x8xf32>
      %153 = arith.subf %149, %152 : vector<8x8xf32>
      %154 = math.exp %153 : vector<8x8xf32>
      %cst_56 = arith.constant dense<0.000000e+00> : vector<8xf32>
      %155 = vector.multi_reduction <add>, %154, %cst_56 [1] : vector<8x8xf32> to vector<8xf32>
      %156 = vector.shape_cast %155 : vector<8xf32> to vector<8x1xf32>
      %157 = vector.broadcast %156 : vector<8x1xf32> to vector<8x8xf32>
      %158 = arith.divf %154, %157 : vector<8x8xf32>
      %159 = vector.extract_strided_slice %101 {offsets = [0, 24], sizes = [8, 8], strides = [1, 1]} : vector<8x32xf32> to vector<8x8xf32>
      %cst_57 = arith.constant dense<0.000000e+00> : vector<8x8xf32>
      %160 = tpu.matmul %158, %159, %cst_57 {dimension_numbers = #tpu.dot_dimension_numbers<[1], [0], [0], [1], [0, 0, 1, 1], [], []>} : vector<8x8xf32>, vector<8x8xf32>, vector<8x8xf32> -> vector<8x8xf32>
      %161 = tpu.concatenate %118, %132, %146, %160 in 1 : vector<8x8xf32>, vector<8x8xf32>, vector<8x8xf32>, vector<8x8xf32> -> vector<8x32xf32>
      %cst_58 = arith.constant dense<0.000000e+00> : vector<8x32xf32>
      %162 = tpu.matmul %161, %104, %cst_58 {dimension_numbers = #tpu.dot_dimension_numbers<[1], [0], [0], [1], [0, 0, 1, 1], [], []>} : vector<8x32xf32>, vector<32x32xf32>, vector<8x32xf32> -> vector<8x32xf32>
      %163 = vector.broadcast %86 : vector<1x32xf32> to vector<8x32xf32>
      %164 = arith.addf %162, %163 : vector<8x32xf32>
      %165 = arith.addf %arg22, %164 : vector<8x32xf32>
      %cst_59 = arith.constant dense<0.000000e+00> : vector<8xf32>
      %166 = vector.multi_reduction <add>, %165, %cst_59 [1] : vector<8x32xf32> to vector<8xf32>
      %167 = vector.shape_cast %166 : vector<8xf32> to vector<8x1xf32>
      %cst_60 = arith.constant 3.200000e+01 : f32
      %168 = vector.broadcast %cst_60 : f32 to vector<8x1xf32>
      %169 = arith.divf %167, %168 : vector<8x1xf32>
      %170 = vector.broadcast %169 : vector<8x1xf32> to vector<8x32xf32>
      %171 = arith.subf %165, %170 : vector<8x32xf32>
      %172 = arith.mulf %171, %171 : vector<8x32xf32>
      %cst_61 = arith.constant dense<0.000000e+00> : vector<8xf32>
      %173 = vector.multi_reduction <add>, %172, %cst_61 [1] : vector<8x32xf32> to vector<8xf32>
      %174 = vector.shape_cast %173 : vector<8xf32> to vector<8x1xf32>
      %cst_62 = arith.constant 3.200000e+01 : f32
      %175 = vector.broadcast %cst_62 : f32 to vector<8x1xf32>
      %176 = arith.divf %174, %175 : vector<8x1xf32>
      %177 = vector.broadcast %169 : vector<8x1xf32> to vector<8x32xf32>
      %178 = arith.subf %165, %177 : vector<8x32xf32>
      %cst_63 = arith.constant 9.99999974E-6 : f32
      %179 = vector.broadcast %cst_63 : f32 to vector<8x1xf32>
      %180 = arith.addf %176, %179 : vector<8x1xf32>
      %181 = math.rsqrt %180 : vector<8x1xf32>
      %182 = vector.broadcast %181 : vector<8x1xf32> to vector<8x32xf32>
      %183 = arith.mulf %178, %182 : vector<8x32xf32>
      %184 = vector.broadcast %89 : vector<1x32xf32> to vector<8x32xf32>
      %185 = arith.mulf %183, %184 : vector<8x32xf32>
      %186 = vector.broadcast %90 : vector<1x32xf32> to vector<8x32xf32>
      %187 = arith.addf %185, %186 : vector<8x32xf32>
      %188 = arith.index_cast %arg21 : i32 to index
      %c0_64 = arith.constant 0 : index
      %c0_65 = arith.constant 0 : index
      %189 = vector.load %arg9[%188, %c0_64, %c0_65] : memref<2x32x64xf32, #tpu.memory_space<vmem>>, vector<1x32x64xf32>
      %190 = vector.shape_cast %189 : vector<1x32x64xf32> to vector<32x64xf32>
      %cst_66 = arith.constant dense<0.000000e+00> : vector<8x64xf32>
      %191 = tpu.matmul %187, %190, %cst_66 {dimension_numbers = #tpu.dot_dimension_numbers<[1], [0], [0], [1], [0, 0, 1, 1], [], []>} : vector<8x32xf32>, vector<32x64xf32>, vector<8x64xf32> -> vector<8x64xf32>
      %192 = vector.broadcast %87 : vector<1x64xf32> to vector<8x64xf32>
      %193 = arith.addf %191, %192 : vector<8x64xf32>
      %cst_67 = arith.constant 0.000000e+00 : f32
      %194 = vector.broadcast %cst_67 : f32 to vector<8x64xf32>
      %195 = arith.maximumf %193, %194 : vector<8x64xf32>
      %196 = arith.index_cast %arg21 : i32 to index
      %c0_68 = arith.constant 0 : index
      %c0_69 = arith.constant 0 : index
      %197 = vector.load %arg10[%196, %c0_68, %c0_69] : memref<2x64x32xf32, #tpu.memory_space<vmem>>, vector<1x64x32xf32>
      %198 = vector.shape_cast %197 : vector<1x64x32xf32> to vector<64x32xf32>
      %cst_70 = arith.constant dense<0.000000e+00> : vector<8x32xf32>
      %199 = tpu.matmul %195, %198, %cst_70 {dimension_numbers = #tpu.dot_dimension_numbers<[1], [0], [0], [1], [0, 0, 1, 1], [], []>} : vector<8x64xf32>, vector<64x32xf32>, vector<8x32xf32> -> vector<8x32xf32>
      %200 = vector.broadcast %88 : vector<1x32xf32> to vector<8x32xf32>
      %201 = arith.addf %199, %200 : vector<8x32xf32>
      %202 = arith.addf %187, %201 : vector<8x32xf32>
      %cst_71 = arith.constant dense<0.000000e+00> : vector<8xf32>
      %203 = vector.multi_reduction <add>, %202, %cst_71 [1] : vector<8x32xf32> to vector<8xf32>
      %204 = vector.shape_cast %203 : vector<8xf32> to vector<8x1xf32>
      %cst_72 = arith.constant 3.200000e+01 : f32
      %205 = vector.broadcast %cst_72 : f32 to vector<8x1xf32>
      %206 = arith.divf %204, %205 : vector<8x1xf32>
      %207 = vector.broadcast %206 : vector<8x1xf32> to vector<8x32xf32>
      %208 = arith.subf %202, %207 : vector<8x32xf32>
      %209 = arith.mulf %208, %208 : vector<8x32xf32>
      %cst_73 = arith.constant dense<0.000000e+00> : vector<8xf32>
      %210 = vector.multi_reduction <add>, %209, %cst_73 [1] : vector<8x32xf32> to vector<8xf32>
      %211 = vector.shape_cast %210 : vector<8xf32> to vector<8x1xf32>
      %cst_74 = arith.constant 3.200000e+01 : f32
      %212 = vector.broadcast %cst_74 : f32 to vector<8x1xf32>
      %213 = arith.divf %211, %212 : vector<8x1xf32>
      %214 = vector.broadcast %206 : vector<8x1xf32> to vector<8x32xf32>
      %215 = arith.subf %202, %214 : vector<8x32xf32>
      %cst_75 = arith.constant 9.99999974E-6 : f32
      %216 = vector.broadcast %cst_75 : f32 to vector<8x1xf32>
      %217 = arith.addf %213, %216 : vector<8x1xf32>
      %218 = math.rsqrt %217 : vector<8x1xf32>
      %219 = vector.broadcast %218 : vector<8x1xf32> to vector<8x32xf32>
      %220 = arith.mulf %215, %219 : vector<8x32xf32>
      %221 = vector.broadcast %91 : vector<1x32xf32> to vector<8x32xf32>
      %222 = arith.mulf %220, %221 : vector<8x32xf32>
      %223 = vector.broadcast %92 : vector<1x32xf32> to vector<8x32xf32>
      %224 = arith.addf %222, %223 : vector<8x32xf32>
      scf.yield %224 : vector<8x32xf32>
    }
    %c2_i32_8 = arith.constant 2 : i32
    %cst_9 = arith.constant dense<0.000000e+00> : vector<8xf32>
    %17 = vector.multi_reduction <add>, %16, %cst_9 [1] : vector<8x32xf32> to vector<8xf32>
    %18 = vector.shape_cast %17 : vector<8xf32> to vector<8x1xf32>
    %cst_10 = arith.constant 3.200000e+01 : f32
    %19 = vector.broadcast %cst_10 : f32 to vector<8x1xf32>
    %20 = arith.divf %18, %19 : vector<8x1xf32>
    %21 = vector.broadcast %20 : vector<8x1xf32> to vector<8x32xf32>
    %22 = arith.subf %16, %21 : vector<8x32xf32>
    %23 = arith.mulf %22, %22 : vector<8x32xf32>
    %cst_11 = arith.constant dense<0.000000e+00> : vector<8xf32>
    %24 = vector.multi_reduction <add>, %23, %cst_11 [1] : vector<8x32xf32> to vector<8xf32>
    %25 = vector.shape_cast %24 : vector<8xf32> to vector<8x1xf32>
    %cst_12 = arith.constant 3.200000e+01 : f32
    %26 = vector.broadcast %cst_12 : f32 to vector<8x1xf32>
    %27 = arith.divf %25, %26 : vector<8x1xf32>
    %28 = vector.broadcast %20 : vector<8x1xf32> to vector<8x32xf32>
    %29 = arith.subf %16, %28 : vector<8x32xf32>
    %cst_13 = arith.constant 9.99999974E-6 : f32
    %30 = vector.broadcast %cst_13 : f32 to vector<8x1xf32>
    %31 = arith.addf %27, %30 : vector<8x1xf32>
    %32 = math.rsqrt %31 : vector<8x1xf32>
    %33 = vector.broadcast %32 : vector<8x1xf32> to vector<8x32xf32>
    %34 = arith.mulf %29, %33 : vector<8x32xf32>
    %35 = vector.broadcast %4 : vector<1x32xf32> to vector<8x32xf32>
    %36 = arith.mulf %34, %35 : vector<8x32xf32>
    %37 = vector.broadcast %5 : vector<1x32xf32> to vector<8x32xf32>
    %38 = arith.addf %36, %37 : vector<8x32xf32>
    %39 = tpu.iota {dimensions = array<i32: 0>} : vector<8x8xi32>
    %40 = tpu.iota {dimensions = array<i32: 1>} : vector<8x8xi32>
    %41 = arith.cmpi sle, %40, %39 : vector<8x8xi32>
    %cst_14 = arith.constant 0.000000e+00 : f32
    %cst_15 = arith.constant -1.000000e+30 : f32
    %42 = vector.broadcast %cst_14 : f32 to vector<8x8xf32>
    %43 = vector.broadcast %cst_15 : f32 to vector<8x8xf32>
    %44 = arith.select %41, %42, %43 : vector<8x8xi1>, vector<8x8xf32>
    %c0_16 = arith.constant 0 : index
    %c0_17 = arith.constant 0 : index
    %c0_18 = arith.constant 0 : index
    %45 = vector.load %arg2[%c0_16, %c0_17, %c0_18] : memref<1x8x24xf32, #tpu.memory_space<vmem>>, vector<1x8x24xf32>
    %46 = vector.shape_cast %45 : vector<1x8x24xf32> to vector<8x24xf32>
    %cst_19 = arith.constant dense<0.000000e+00> : vector<8x32xf32>
    %47 = tpu.matmul %46, %8, %cst_19 {dimension_numbers = #tpu.dot_dimension_numbers<[1], [0], [0], [1], [0, 0, 1, 1], [], []>} : vector<8x24xf32>, vector<24x32xf32>, vector<8x32xf32> -> vector<8x32xf32>
    %48 = vector.broadcast %2 : vector<1x32xf32> to vector<8x32xf32>
    %49 = arith.addf %47, %48 : vector<8x32xf32>
    %50 = arith.addf %49, %0 : vector<8x32xf32>
    %c0_i32_20 = arith.constant 0 : i32
    %c2_i32_21 = arith.constant 2 : i32
    %51 = arith.addi %c0_i32_20, %c2_i32_21 : i32
    %c1_i32_22 = arith.constant 1 : i32
    %52 = scf.for %arg21 = %c0_i32_20 to %51 step %c1_i32_22 iter_args(%arg22 = %50) -> (vector<8x32xf32>)  : i32 {
      %82 = arith.index_cast %arg21 : i32 to index
      %c0_35 = arith.constant 0 : index
      %c0_36 = arith.constant 0 : index
      %83 = vector.load %arg19[%82, %c0_35, %c0_36] : memref<2x13x128xf32, #tpu.memory_space<vmem>>, vector<1x13x128xf32>
      %84 = vector.shape_cast %83 : vector<1x13x128xf32> to vector<13x128xf32>
      %85 = vector.extract_strided_slice %84 {offsets = [0, 0], sizes = [1, 96], strides = [1, 1]} : vector<13x128xf32> to vector<1x96xf32>
      %86 = vector.extract_strided_slice %84 {offsets = [1, 0], sizes = [1, 32], strides = [1, 1]} : vector<13x128xf32> to vector<1x32xf32>
      %87 = vector.extract_strided_slice %84 {offsets = [2, 0], sizes = [1, 32], strides = [1, 1]} : vector<13x128xf32> to vector<1x32xf32>
      %88 = vector.extract_strided_slice %84 {offsets = [3, 0], sizes = [1, 64], strides = [1, 1]} : vector<13x128xf32> to vector<1x64xf32>
      %89 = vector.extract_strided_slice %84 {offsets = [4, 0], sizes = [1, 32], strides = [1, 1]} : vector<13x128xf32> to vector<1x32xf32>
      %90 = vector.extract_strided_slice %84 {offsets = [5, 0], sizes = [1, 64], strides = [1, 1]} : vector<13x128xf32> to vector<1x64xf32>
      %91 = vector.extract_strided_slice %84 {offsets = [6, 0], sizes = [1, 32], strides = [1, 1]} : vector<13x128xf32> to vector<1x32xf32>
      %92 = vector.extract_strided_slice %84 {offsets = [7, 0], sizes = [1, 32], strides = [1, 1]} : vector<13x128xf32> to vector<1x32xf32>
      %93 = vector.extract_strided_slice %84 {offsets = [8, 0], sizes = [1, 32], strides = [1, 1]} : vector<13x128xf32> to vector<1x32xf32>
      %94 = vector.extract_strided_slice %84 {offsets = [9, 0], sizes = [1, 32], strides = [1, 1]} : vector<13x128xf32> to vector<1x32xf32>
      %95 = vector.extract_strided_slice %84 {offsets = [10, 0], sizes = [1, 32], strides = [1, 1]} : vector<13x128xf32> to vector<1x32xf32>
      %96 = vector.extract_strided_slice %84 {offsets = [11, 0], sizes = [1, 32], strides = [1, 1]} : vector<13x128xf32> to vector<1x32xf32>
      %97 = vector.extract_strided_slice %84 {offsets = [12, 0], sizes = [1, 32], strides = [1, 1]} : vector<13x128xf32> to vector<1x32xf32>
      %98 = arith.index_cast %arg21 : i32 to index
      %c0_37 = arith.constant 0 : index
      %c0_38 = arith.constant 0 : index
      %99 = vector.load %arg12[%98, %c0_37, %c0_38] : memref<2x32x96xf32, #tpu.memory_space<vmem>>, vector<1x32x96xf32>
      %100 = vector.shape_cast %99 : vector<1x32x96xf32> to vector<32x96xf32>
      %cst_39 = arith.constant dense<0.000000e+00> : vector<8x96xf32>
      %101 = tpu.matmul %arg22, %100, %cst_39 {dimension_numbers = #tpu.dot_dimension_numbers<[1], [0], [0], [1], [0, 0, 1, 1], [], []>} : vector<8x32xf32>, vector<32x96xf32>, vector<8x96xf32> -> vector<8x96xf32>
      %102 = vector.broadcast %85 : vector<1x96xf32> to vector<8x96xf32>
      %103 = arith.addf %101, %102 : vector<8x96xf32>
      %104 = vector.extract_strided_slice %103 {offsets = [0, 0], sizes = [8, 32], strides = [1, 1]} : vector<8x96xf32> to vector<8x32xf32>
      %105 = vector.extract_strided_slice %103 {offsets = [0, 32], sizes = [8, 32], strides = [1, 1]} : vector<8x96xf32> to vector<8x32xf32>
      %106 = vector.extract_strided_slice %103 {offsets = [0, 64], sizes = [8, 32], strides = [1, 1]} : vector<8x96xf32> to vector<8x32xf32>
      %107 = arith.index_cast %arg21 : i32 to index
      %c0_40 = arith.constant 0 : index
      %c0_41 = arith.constant 0 : index
      %108 = vector.load %arg13[%107, %c0_40, %c0_41] : memref<2x32x32xf32, #tpu.memory_space<vmem>>, vector<1x32x32xf32>
      %109 = vector.shape_cast %108 : vector<1x32x32xf32> to vector<32x32xf32>
      %110 = vector.extract_strided_slice %104 {offsets = [0, 0], sizes = [8, 8], strides = [1, 1]} : vector<8x32xf32> to vector<8x8xf32>
      %111 = vector.extract_strided_slice %105 {offsets = [0, 0], sizes = [8, 8], strides = [1, 1]} : vector<8x32xf32> to vector<8x8xf32>
      %cst_42 = arith.constant dense<0.000000e+00> : vector<8x8xf32>
      %112 = tpu.matmul %110, %111, %cst_42 {dimension_numbers = #tpu.dot_dimension_numbers<[1], [1], [0], [0], [0, 0, 1, 0], [], []>} : vector<8x8xf32>, vector<8x8xf32>, vector<8x8xf32> -> vector<8x8xf32>
      %113 = arith.addf %112, %44 : vector<8x8xf32>
      %cst_43 = arith.constant dense<0xFF800000> : vector<8xf32>
      %114 = vector.multi_reduction <maximumf>, %113, %cst_43 [1] : vector<8x8xf32> to vector<8xf32>
      %115 = vector.shape_cast %114 : vector<8xf32> to vector<8x1xf32>
      %116 = vector.broadcast %115 : vector<8x1xf32> to vector<8x8xf32>
      %117 = arith.subf %113, %116 : vector<8x8xf32>
      %118 = math.exp %117 : vector<8x8xf32>
      %cst_44 = arith.constant dense<0.000000e+00> : vector<8xf32>
      %119 = vector.multi_reduction <add>, %118, %cst_44 [1] : vector<8x8xf32> to vector<8xf32>
      %120 = vector.shape_cast %119 : vector<8xf32> to vector<8x1xf32>
      %121 = vector.broadcast %120 : vector<8x1xf32> to vector<8x8xf32>
      %122 = arith.divf %118, %121 : vector<8x8xf32>
      %123 = vector.extract_strided_slice %106 {offsets = [0, 0], sizes = [8, 8], strides = [1, 1]} : vector<8x32xf32> to vector<8x8xf32>
      %cst_45 = arith.constant dense<0.000000e+00> : vector<8x8xf32>
      %124 = tpu.matmul %122, %123, %cst_45 {dimension_numbers = #tpu.dot_dimension_numbers<[1], [0], [0], [1], [0, 0, 1, 1], [], []>} : vector<8x8xf32>, vector<8x8xf32>, vector<8x8xf32> -> vector<8x8xf32>
      %125 = vector.extract_strided_slice %104 {offsets = [0, 8], sizes = [8, 8], strides = [1, 1]} : vector<8x32xf32> to vector<8x8xf32>
      %126 = vector.extract_strided_slice %105 {offsets = [0, 8], sizes = [8, 8], strides = [1, 1]} : vector<8x32xf32> to vector<8x8xf32>
      %cst_46 = arith.constant dense<0.000000e+00> : vector<8x8xf32>
      %127 = tpu.matmul %125, %126, %cst_46 {dimension_numbers = #tpu.dot_dimension_numbers<[1], [1], [0], [0], [0, 0, 1, 0], [], []>} : vector<8x8xf32>, vector<8x8xf32>, vector<8x8xf32> -> vector<8x8xf32>
      %128 = arith.addf %127, %44 : vector<8x8xf32>
      %cst_47 = arith.constant dense<0xFF800000> : vector<8xf32>
      %129 = vector.multi_reduction <maximumf>, %128, %cst_47 [1] : vector<8x8xf32> to vector<8xf32>
      %130 = vector.shape_cast %129 : vector<8xf32> to vector<8x1xf32>
      %131 = vector.broadcast %130 : vector<8x1xf32> to vector<8x8xf32>
      %132 = arith.subf %128, %131 : vector<8x8xf32>
      %133 = math.exp %132 : vector<8x8xf32>
      %cst_48 = arith.constant dense<0.000000e+00> : vector<8xf32>
      %134 = vector.multi_reduction <add>, %133, %cst_48 [1] : vector<8x8xf32> to vector<8xf32>
      %135 = vector.shape_cast %134 : vector<8xf32> to vector<8x1xf32>
      %136 = vector.broadcast %135 : vector<8x1xf32> to vector<8x8xf32>
      %137 = arith.divf %133, %136 : vector<8x8xf32>
      %138 = vector.extract_strided_slice %106 {offsets = [0, 8], sizes = [8, 8], strides = [1, 1]} : vector<8x32xf32> to vector<8x8xf32>
      %cst_49 = arith.constant dense<0.000000e+00> : vector<8x8xf32>
      %139 = tpu.matmul %137, %138, %cst_49 {dimension_numbers = #tpu.dot_dimension_numbers<[1], [0], [0], [1], [0, 0, 1, 1], [], []>} : vector<8x8xf32>, vector<8x8xf32>, vector<8x8xf32> -> vector<8x8xf32>
      %140 = vector.extract_strided_slice %104 {offsets = [0, 16], sizes = [8, 8], strides = [1, 1]} : vector<8x32xf32> to vector<8x8xf32>
      %141 = vector.extract_strided_slice %105 {offsets = [0, 16], sizes = [8, 8], strides = [1, 1]} : vector<8x32xf32> to vector<8x8xf32>
      %cst_50 = arith.constant dense<0.000000e+00> : vector<8x8xf32>
      %142 = tpu.matmul %140, %141, %cst_50 {dimension_numbers = #tpu.dot_dimension_numbers<[1], [1], [0], [0], [0, 0, 1, 0], [], []>} : vector<8x8xf32>, vector<8x8xf32>, vector<8x8xf32> -> vector<8x8xf32>
      %143 = arith.addf %142, %44 : vector<8x8xf32>
      %cst_51 = arith.constant dense<0xFF800000> : vector<8xf32>
      %144 = vector.multi_reduction <maximumf>, %143, %cst_51 [1] : vector<8x8xf32> to vector<8xf32>
      %145 = vector.shape_cast %144 : vector<8xf32> to vector<8x1xf32>
      %146 = vector.broadcast %145 : vector<8x1xf32> to vector<8x8xf32>
      %147 = arith.subf %143, %146 : vector<8x8xf32>
      %148 = math.exp %147 : vector<8x8xf32>
      %cst_52 = arith.constant dense<0.000000e+00> : vector<8xf32>
      %149 = vector.multi_reduction <add>, %148, %cst_52 [1] : vector<8x8xf32> to vector<8xf32>
      %150 = vector.shape_cast %149 : vector<8xf32> to vector<8x1xf32>
      %151 = vector.broadcast %150 : vector<8x1xf32> to vector<8x8xf32>
      %152 = arith.divf %148, %151 : vector<8x8xf32>
      %153 = vector.extract_strided_slice %106 {offsets = [0, 16], sizes = [8, 8], strides = [1, 1]} : vector<8x32xf32> to vector<8x8xf32>
      %cst_53 = arith.constant dense<0.000000e+00> : vector<8x8xf32>
      %154 = tpu.matmul %152, %153, %cst_53 {dimension_numbers = #tpu.dot_dimension_numbers<[1], [0], [0], [1], [0, 0, 1, 1], [], []>} : vector<8x8xf32>, vector<8x8xf32>, vector<8x8xf32> -> vector<8x8xf32>
      %155 = vector.extract_strided_slice %104 {offsets = [0, 24], sizes = [8, 8], strides = [1, 1]} : vector<8x32xf32> to vector<8x8xf32>
      %156 = vector.extract_strided_slice %105 {offsets = [0, 24], sizes = [8, 8], strides = [1, 1]} : vector<8x32xf32> to vector<8x8xf32>
      %cst_54 = arith.constant dense<0.000000e+00> : vector<8x8xf32>
      %157 = tpu.matmul %155, %156, %cst_54 {dimension_numbers = #tpu.dot_dimension_numbers<[1], [1], [0], [0], [0, 0, 1, 0], [], []>} : vector<8x8xf32>, vector<8x8xf32>, vector<8x8xf32> -> vector<8x8xf32>
      %158 = arith.addf %157, %44 : vector<8x8xf32>
      %cst_55 = arith.constant dense<0xFF800000> : vector<8xf32>
      %159 = vector.multi_reduction <maximumf>, %158, %cst_55 [1] : vector<8x8xf32> to vector<8xf32>
      %160 = vector.shape_cast %159 : vector<8xf32> to vector<8x1xf32>
      %161 = vector.broadcast %160 : vector<8x1xf32> to vector<8x8xf32>
      %162 = arith.subf %158, %161 : vector<8x8xf32>
      %163 = math.exp %162 : vector<8x8xf32>
      %cst_56 = arith.constant dense<0.000000e+00> : vector<8xf32>
      %164 = vector.multi_reduction <add>, %163, %cst_56 [1] : vector<8x8xf32> to vector<8xf32>
      %165 = vector.shape_cast %164 : vector<8xf32> to vector<8x1xf32>
      %166 = vector.broadcast %165 : vector<8x1xf32> to vector<8x8xf32>
      %167 = arith.divf %163, %166 : vector<8x8xf32>
      %168 = vector.extract_strided_slice %106 {offsets = [0, 24], sizes = [8, 8], strides = [1, 1]} : vector<8x32xf32> to vector<8x8xf32>
      %cst_57 = arith.constant dense<0.000000e+00> : vector<8x8xf32>
      %169 = tpu.matmul %167, %168, %cst_57 {dimension_numbers = #tpu.dot_dimension_numbers<[1], [0], [0], [1], [0, 0, 1, 1], [], []>} : vector<8x8xf32>, vector<8x8xf32>, vector<8x8xf32> -> vector<8x8xf32>
      %170 = tpu.concatenate %124, %139, %154, %169 in 1 : vector<8x8xf32>, vector<8x8xf32>, vector<8x8xf32>, vector<8x8xf32> -> vector<8x32xf32>
      %cst_58 = arith.constant dense<0.000000e+00> : vector<8x32xf32>
      %171 = tpu.matmul %170, %109, %cst_58 {dimension_numbers = #tpu.dot_dimension_numbers<[1], [0], [0], [1], [0, 0, 1, 1], [], []>} : vector<8x32xf32>, vector<32x32xf32>, vector<8x32xf32> -> vector<8x32xf32>
      %172 = vector.broadcast %86 : vector<1x32xf32> to vector<8x32xf32>
      %173 = arith.addf %171, %172 : vector<8x32xf32>
      %174 = arith.addf %arg22, %173 : vector<8x32xf32>
      %cst_59 = arith.constant dense<0.000000e+00> : vector<8xf32>
      %175 = vector.multi_reduction <add>, %174, %cst_59 [1] : vector<8x32xf32> to vector<8xf32>
      %176 = vector.shape_cast %175 : vector<8xf32> to vector<8x1xf32>
      %cst_60 = arith.constant 3.200000e+01 : f32
      %177 = vector.broadcast %cst_60 : f32 to vector<8x1xf32>
      %178 = arith.divf %176, %177 : vector<8x1xf32>
      %179 = vector.broadcast %178 : vector<8x1xf32> to vector<8x32xf32>
      %180 = arith.subf %174, %179 : vector<8x32xf32>
      %181 = arith.mulf %180, %180 : vector<8x32xf32>
      %cst_61 = arith.constant dense<0.000000e+00> : vector<8xf32>
      %182 = vector.multi_reduction <add>, %181, %cst_61 [1] : vector<8x32xf32> to vector<8xf32>
      %183 = vector.shape_cast %182 : vector<8xf32> to vector<8x1xf32>
      %cst_62 = arith.constant 3.200000e+01 : f32
      %184 = vector.broadcast %cst_62 : f32 to vector<8x1xf32>
      %185 = arith.divf %183, %184 : vector<8x1xf32>
      %186 = vector.broadcast %178 : vector<8x1xf32> to vector<8x32xf32>
      %187 = arith.subf %174, %186 : vector<8x32xf32>
      %cst_63 = arith.constant 9.99999974E-6 : f32
      %188 = vector.broadcast %cst_63 : f32 to vector<8x1xf32>
      %189 = arith.addf %185, %188 : vector<8x1xf32>
      %190 = math.rsqrt %189 : vector<8x1xf32>
      %191 = vector.broadcast %190 : vector<8x1xf32> to vector<8x32xf32>
      %192 = arith.mulf %187, %191 : vector<8x32xf32>
      %193 = vector.broadcast %92 : vector<1x32xf32> to vector<8x32xf32>
      %194 = arith.mulf %192, %193 : vector<8x32xf32>
      %195 = vector.broadcast %93 : vector<1x32xf32> to vector<8x32xf32>
      %196 = arith.addf %194, %195 : vector<8x32xf32>
      %197 = arith.index_cast %arg21 : i32 to index
      %c0_64 = arith.constant 0 : index
      %c0_65 = arith.constant 0 : index
      %198 = vector.load %arg14[%197, %c0_64, %c0_65] : memref<2x32x32xf32, #tpu.memory_space<vmem>>, vector<1x32x32xf32>
      %199 = vector.shape_cast %198 : vector<1x32x32xf32> to vector<32x32xf32>
      %cst_66 = arith.constant dense<0.000000e+00> : vector<8x32xf32>
      %200 = tpu.matmul %196, %199, %cst_66 {dimension_numbers = #tpu.dot_dimension_numbers<[1], [0], [0], [1], [0, 0, 1, 1], [], []>} : vector<8x32xf32>, vector<32x32xf32>, vector<8x32xf32> -> vector<8x32xf32>
      %201 = vector.broadcast %87 : vector<1x32xf32> to vector<8x32xf32>
      %202 = arith.addf %200, %201 : vector<8x32xf32>
      %203 = arith.index_cast %arg21 : i32 to index
      %c0_67 = arith.constant 0 : index
      %c0_68 = arith.constant 0 : index
      %204 = vector.load %arg15[%203, %c0_67, %c0_68] : memref<2x32x64xf32, #tpu.memory_space<vmem>>, vector<1x32x64xf32>
      %205 = vector.shape_cast %204 : vector<1x32x64xf32> to vector<32x64xf32>
      %cst_69 = arith.constant dense<0.000000e+00> : vector<8x64xf32>
      %206 = tpu.matmul %38, %205, %cst_69 {dimension_numbers = #tpu.dot_dimension_numbers<[1], [0], [0], [1], [0, 0, 1, 1], [], []>} : vector<8x32xf32>, vector<32x64xf32>, vector<8x64xf32> -> vector<8x64xf32>
      %207 = vector.broadcast %88 : vector<1x64xf32> to vector<8x64xf32>
      %208 = arith.addf %206, %207 : vector<8x64xf32>
      %209 = vector.extract_strided_slice %208 {offsets = [0, 0], sizes = [8, 32], strides = [1, 1]} : vector<8x64xf32> to vector<8x32xf32>
      %210 = vector.extract_strided_slice %208 {offsets = [0, 32], sizes = [8, 32], strides = [1, 1]} : vector<8x64xf32> to vector<8x32xf32>
      %211 = arith.index_cast %arg21 : i32 to index
      %c0_70 = arith.constant 0 : index
      %c0_71 = arith.constant 0 : index
      %212 = vector.load %arg16[%211, %c0_70, %c0_71] : memref<2x32x32xf32, #tpu.memory_space<vmem>>, vector<1x32x32xf32>
      %213 = vector.shape_cast %212 : vector<1x32x32xf32> to vector<32x32xf32>
      %214 = vector.extract_strided_slice %202 {offsets = [0, 0], sizes = [8, 8], strides = [1, 1]} : vector<8x32xf32> to vector<8x8xf32>
      %215 = vector.extract_strided_slice %209 {offsets = [0, 0], sizes = [8, 8], strides = [1, 1]} : vector<8x32xf32> to vector<8x8xf32>
      %cst_72 = arith.constant dense<0.000000e+00> : vector<8x8xf32>
      %216 = tpu.matmul %214, %215, %cst_72 {dimension_numbers = #tpu.dot_dimension_numbers<[1], [1], [0], [0], [0, 0, 1, 0], [], []>} : vector<8x8xf32>, vector<8x8xf32>, vector<8x8xf32> -> vector<8x8xf32>
      %cst_73 = arith.constant dense<0xFF800000> : vector<8xf32>
      %217 = vector.multi_reduction <maximumf>, %216, %cst_73 [1] : vector<8x8xf32> to vector<8xf32>
      %218 = vector.shape_cast %217 : vector<8xf32> to vector<8x1xf32>
      %219 = vector.broadcast %218 : vector<8x1xf32> to vector<8x8xf32>
      %220 = arith.subf %216, %219 : vector<8x8xf32>
      %221 = math.exp %220 : vector<8x8xf32>
      %cst_74 = arith.constant dense<0.000000e+00> : vector<8xf32>
      %222 = vector.multi_reduction <add>, %221, %cst_74 [1] : vector<8x8xf32> to vector<8xf32>
      %223 = vector.shape_cast %222 : vector<8xf32> to vector<8x1xf32>
      %224 = vector.broadcast %223 : vector<8x1xf32> to vector<8x8xf32>
      %225 = arith.divf %221, %224 : vector<8x8xf32>
      %226 = vector.extract_strided_slice %210 {offsets = [0, 0], sizes = [8, 8], strides = [1, 1]} : vector<8x32xf32> to vector<8x8xf32>
      %cst_75 = arith.constant dense<0.000000e+00> : vector<8x8xf32>
      %227 = tpu.matmul %225, %226, %cst_75 {dimension_numbers = #tpu.dot_dimension_numbers<[1], [0], [0], [1], [0, 0, 1, 1], [], []>} : vector<8x8xf32>, vector<8x8xf32>, vector<8x8xf32> -> vector<8x8xf32>
      %228 = vector.extract_strided_slice %202 {offsets = [0, 8], sizes = [8, 8], strides = [1, 1]} : vector<8x32xf32> to vector<8x8xf32>
      %229 = vector.extract_strided_slice %209 {offsets = [0, 8], sizes = [8, 8], strides = [1, 1]} : vector<8x32xf32> to vector<8x8xf32>
      %cst_76 = arith.constant dense<0.000000e+00> : vector<8x8xf32>
      %230 = tpu.matmul %228, %229, %cst_76 {dimension_numbers = #tpu.dot_dimension_numbers<[1], [1], [0], [0], [0, 0, 1, 0], [], []>} : vector<8x8xf32>, vector<8x8xf32>, vector<8x8xf32> -> vector<8x8xf32>
      %cst_77 = arith.constant dense<0xFF800000> : vector<8xf32>
      %231 = vector.multi_reduction <maximumf>, %230, %cst_77 [1] : vector<8x8xf32> to vector<8xf32>
      %232 = vector.shape_cast %231 : vector<8xf32> to vector<8x1xf32>
      %233 = vector.broadcast %232 : vector<8x1xf32> to vector<8x8xf32>
      %234 = arith.subf %230, %233 : vector<8x8xf32>
      %235 = math.exp %234 : vector<8x8xf32>
      %cst_78 = arith.constant dense<0.000000e+00> : vector<8xf32>
      %236 = vector.multi_reduction <add>, %235, %cst_78 [1] : vector<8x8xf32> to vector<8xf32>
      %237 = vector.shape_cast %236 : vector<8xf32> to vector<8x1xf32>
      %238 = vector.broadcast %237 : vector<8x1xf32> to vector<8x8xf32>
      %239 = arith.divf %235, %238 : vector<8x8xf32>
      %240 = vector.extract_strided_slice %210 {offsets = [0, 8], sizes = [8, 8], strides = [1, 1]} : vector<8x32xf32> to vector<8x8xf32>
      %cst_79 = arith.constant dense<0.000000e+00> : vector<8x8xf32>
      %241 = tpu.matmul %239, %240, %cst_79 {dimension_numbers = #tpu.dot_dimension_numbers<[1], [0], [0], [1], [0, 0, 1, 1], [], []>} : vector<8x8xf32>, vector<8x8xf32>, vector<8x8xf32> -> vector<8x8xf32>
      %242 = vector.extract_strided_slice %202 {offsets = [0, 16], sizes = [8, 8], strides = [1, 1]} : vector<8x32xf32> to vector<8x8xf32>
      %243 = vector.extract_strided_slice %209 {offsets = [0, 16], sizes = [8, 8], strides = [1, 1]} : vector<8x32xf32> to vector<8x8xf32>
      %cst_80 = arith.constant dense<0.000000e+00> : vector<8x8xf32>
      %244 = tpu.matmul %242, %243, %cst_80 {dimension_numbers = #tpu.dot_dimension_numbers<[1], [1], [0], [0], [0, 0, 1, 0], [], []>} : vector<8x8xf32>, vector<8x8xf32>, vector<8x8xf32> -> vector<8x8xf32>
      %cst_81 = arith.constant dense<0xFF800000> : vector<8xf32>
      %245 = vector.multi_reduction <maximumf>, %244, %cst_81 [1] : vector<8x8xf32> to vector<8xf32>
      %246 = vector.shape_cast %245 : vector<8xf32> to vector<8x1xf32>
      %247 = vector.broadcast %246 : vector<8x1xf32> to vector<8x8xf32>
      %248 = arith.subf %244, %247 : vector<8x8xf32>
      %249 = math.exp %248 : vector<8x8xf32>
      %cst_82 = arith.constant dense<0.000000e+00> : vector<8xf32>
      %250 = vector.multi_reduction <add>, %249, %cst_82 [1] : vector<8x8xf32> to vector<8xf32>
      %251 = vector.shape_cast %250 : vector<8xf32> to vector<8x1xf32>
      %252 = vector.broadcast %251 : vector<8x1xf32> to vector<8x8xf32>
      %253 = arith.divf %249, %252 : vector<8x8xf32>
      %254 = vector.extract_strided_slice %210 {offsets = [0, 16], sizes = [8, 8], strides = [1, 1]} : vector<8x32xf32> to vector<8x8xf32>
      %cst_83 = arith.constant dense<0.000000e+00> : vector<8x8xf32>
      %255 = tpu.matmul %253, %254, %cst_83 {dimension_numbers = #tpu.dot_dimension_numbers<[1], [0], [0], [1], [0, 0, 1, 1], [], []>} : vector<8x8xf32>, vector<8x8xf32>, vector<8x8xf32> -> vector<8x8xf32>
      %256 = vector.extract_strided_slice %202 {offsets = [0, 24], sizes = [8, 8], strides = [1, 1]} : vector<8x32xf32> to vector<8x8xf32>
      %257 = vector.extract_strided_slice %209 {offsets = [0, 24], sizes = [8, 8], strides = [1, 1]} : vector<8x32xf32> to vector<8x8xf32>
      %cst_84 = arith.constant dense<0.000000e+00> : vector<8x8xf32>
      %258 = tpu.matmul %256, %257, %cst_84 {dimension_numbers = #tpu.dot_dimension_numbers<[1], [1], [0], [0], [0, 0, 1, 0], [], []>} : vector<8x8xf32>, vector<8x8xf32>, vector<8x8xf32> -> vector<8x8xf32>
      %cst_85 = arith.constant dense<0xFF800000> : vector<8xf32>
      %259 = vector.multi_reduction <maximumf>, %258, %cst_85 [1] : vector<8x8xf32> to vector<8xf32>
      %260 = vector.shape_cast %259 : vector<8xf32> to vector<8x1xf32>
      %261 = vector.broadcast %260 : vector<8x1xf32> to vector<8x8xf32>
      %262 = arith.subf %258, %261 : vector<8x8xf32>
      %263 = math.exp %262 : vector<8x8xf32>
      %cst_86 = arith.constant dense<0.000000e+00> : vector<8xf32>
      %264 = vector.multi_reduction <add>, %263, %cst_86 [1] : vector<8x8xf32> to vector<8xf32>
      %265 = vector.shape_cast %264 : vector<8xf32> to vector<8x1xf32>
      %266 = vector.broadcast %265 : vector<8x1xf32> to vector<8x8xf32>
      %267 = arith.divf %263, %266 : vector<8x8xf32>
      %268 = vector.extract_strided_slice %210 {offsets = [0, 24], sizes = [8, 8], strides = [1, 1]} : vector<8x32xf32> to vector<8x8xf32>
      %cst_87 = arith.constant dense<0.000000e+00> : vector<8x8xf32>
      %269 = tpu.matmul %267, %268, %cst_87 {dimension_numbers = #tpu.dot_dimension_numbers<[1], [0], [0], [1], [0, 0, 1, 1], [], []>} : vector<8x8xf32>, vector<8x8xf32>, vector<8x8xf32> -> vector<8x8xf32>
      %270 = tpu.concatenate %227, %241, %255, %269 in 1 : vector<8x8xf32>, vector<8x8xf32>, vector<8x8xf32>, vector<8x8xf32> -> vector<8x32xf32>
      %cst_88 = arith.constant dense<0.000000e+00> : vector<8x32xf32>
      %271 = tpu.matmul %270, %213, %cst_88 {dimension_numbers = #tpu.dot_dimension_numbers<[1], [0], [0], [1], [0, 0, 1, 1], [], []>} : vector<8x32xf32>, vector<32x32xf32>, vector<8x32xf32> -> vector<8x32xf32>
      %272 = vector.broadcast %89 : vector<1x32xf32> to vector<8x32xf32>
      %273 = arith.addf %271, %272 : vector<8x32xf32>
      %274 = arith.addf %196, %273 : vector<8x32xf32>
      %cst_89 = arith.constant dense<0.000000e+00> : vector<8xf32>
      %275 = vector.multi_reduction <add>, %274, %cst_89 [1] : vector<8x32xf32> to vector<8xf32>
      %276 = vector.shape_cast %275 : vector<8xf32> to vector<8x1xf32>
      %cst_90 = arith.constant 3.200000e+01 : f32
      %277 = vector.broadcast %cst_90 : f32 to vector<8x1xf32>
      %278 = arith.divf %276, %277 : vector<8x1xf32>
      %279 = vector.broadcast %278 : vector<8x1xf32> to vector<8x32xf32>
      %280 = arith.subf %274, %279 : vector<8x32xf32>
      %281 = arith.mulf %280, %280 : vector<8x32xf32>
      %cst_91 = arith.constant dense<0.000000e+00> : vector<8xf32>
      %282 = vector.multi_reduction <add>, %281, %cst_91 [1] : vector<8x32xf32> to vector<8xf32>
      %283 = vector.shape_cast %282 : vector<8xf32> to vector<8x1xf32>
      %cst_92 = arith.constant 3.200000e+01 : f32
      %284 = vector.broadcast %cst_92 : f32 to vector<8x1xf32>
      %285 = arith.divf %283, %284 : vector<8x1xf32>
      %286 = vector.broadcast %278 : vector<8x1xf32> to vector<8x32xf32>
      %287 = arith.subf %274, %286 : vector<8x32xf32>
      %cst_93 = arith.constant 9.99999974E-6 : f32
      %288 = vector.broadcast %cst_93 : f32 to vector<8x1xf32>
      %289 = arith.addf %285, %288 : vector<8x1xf32>
      %290 = math.rsqrt %289 : vector<8x1xf32>
      %291 = vector.broadcast %290 : vector<8x1xf32> to vector<8x32xf32>
      %292 = arith.mulf %287, %291 : vector<8x32xf32>
      %293 = vector.broadcast %94 : vector<1x32xf32> to vector<8x32xf32>
      %294 = arith.mulf %292, %293 : vector<8x32xf32>
      %295 = vector.broadcast %95 : vector<1x32xf32> to vector<8x32xf32>
      %296 = arith.addf %294, %295 : vector<8x32xf32>
      %297 = arith.index_cast %arg21 : i32 to index
      %c0_94 = arith.constant 0 : index
      %c0_95 = arith.constant 0 : index
      %298 = vector.load %arg17[%297, %c0_94, %c0_95] : memref<2x32x64xf32, #tpu.memory_space<vmem>>, vector<1x32x64xf32>
      %299 = vector.shape_cast %298 : vector<1x32x64xf32> to vector<32x64xf32>
      %cst_96 = arith.constant dense<0.000000e+00> : vector<8x64xf32>
      %300 = tpu.matmul %296, %299, %cst_96 {dimension_numbers = #tpu.dot_dimension_numbers<[1], [0], [0], [1], [0, 0, 1, 1], [], []>} : vector<8x32xf32>, vector<32x64xf32>, vector<8x64xf32> -> vector<8x64xf32>
      %301 = vector.broadcast %90 : vector<1x64xf32> to vector<8x64xf32>
      %302 = arith.addf %300, %301 : vector<8x64xf32>
      %cst_97 = arith.constant 0.000000e+00 : f32
      %303 = vector.broadcast %cst_97 : f32 to vector<8x64xf32>
      %304 = arith.maximumf %302, %303 : vector<8x64xf32>
      %305 = arith.index_cast %arg21 : i32 to index
      %c0_98 = arith.constant 0 : index
      %c0_99 = arith.constant 0 : index
      %306 = vector.load %arg18[%305, %c0_98, %c0_99] : memref<2x64x32xf32, #tpu.memory_space<vmem>>, vector<1x64x32xf32>
      %307 = vector.shape_cast %306 : vector<1x64x32xf32> to vector<64x32xf32>
      %cst_100 = arith.constant dense<0.000000e+00> : vector<8x32xf32>
      %308 = tpu.matmul %304, %307, %cst_100 {dimension_numbers = #tpu.dot_dimension_numbers<[1], [0], [0], [1], [0, 0, 1, 1], [], []>} : vector<8x64xf32>, vector<64x32xf32>, vector<8x32xf32> -> vector<8x32xf32>
      %309 = vector.broadcast %91 : vector<1x32xf32> to vector<8x32xf32>
      %310 = arith.addf %308, %309 : vector<8x32xf32>
      %311 = arith.addf %296, %310 : vector<8x32xf32>
      %cst_101 = arith.constant dense<0.000000e+00> : vector<8xf32>
      %312 = vector.multi_reduction <add>, %311, %cst_101 [1] : vector<8x32xf32> to vector<8xf32>
      %313 = vector.shape_cast %312 : vector<8xf32> to vector<8x1xf32>
      %cst_102 = arith.constant 3.200000e+01 : f32
      %314 = vector.broadcast %cst_102 : f32 to vector<8x1xf32>
      %315 = arith.divf %313, %314 : vector<8x1xf32>
      %316 = vector.broadcast %315 : vector<8x1xf32> to vector<8x32xf32>
      %317 = arith.subf %311, %316 : vector<8x32xf32>
      %318 = arith.mulf %317, %317 : vector<8x32xf32>
      %cst_103 = arith.constant dense<0.000000e+00> : vector<8xf32>
      %319 = vector.multi_reduction <add>, %318, %cst_103 [1] : vector<8x32xf32> to vector<8xf32>
      %320 = vector.shape_cast %319 : vector<8xf32> to vector<8x1xf32>
      %cst_104 = arith.constant 3.200000e+01 : f32
      %321 = vector.broadcast %cst_104 : f32 to vector<8x1xf32>
      %322 = arith.divf %320, %321 : vector<8x1xf32>
      %323 = vector.broadcast %315 : vector<8x1xf32> to vector<8x32xf32>
      %324 = arith.subf %311, %323 : vector<8x32xf32>
      %cst_105 = arith.constant 9.99999974E-6 : f32
      %325 = vector.broadcast %cst_105 : f32 to vector<8x1xf32>
      %326 = arith.addf %322, %325 : vector<8x1xf32>
      %327 = math.rsqrt %326 : vector<8x1xf32>
      %328 = vector.broadcast %327 : vector<8x1xf32> to vector<8x32xf32>
      %329 = arith.mulf %324, %328 : vector<8x32xf32>
      %330 = vector.broadcast %96 : vector<1x32xf32> to vector<8x32xf32>
      %331 = arith.mulf %329, %330 : vector<8x32xf32>
      %332 = vector.broadcast %97 : vector<1x32xf32> to vector<8x32xf32>
      %333 = arith.addf %331, %332 : vector<8x32xf32>
      scf.yield %333 : vector<8x32xf32>
    }
    %c2_i32_23 = arith.constant 2 : i32
    %cst_24 = arith.constant dense<0.000000e+00> : vector<8xf32>
    %53 = vector.multi_reduction <add>, %52, %cst_24 [1] : vector<8x32xf32> to vector<8xf32>
    %54 = vector.shape_cast %53 : vector<8xf32> to vector<8x1xf32>
    %cst_25 = arith.constant 3.200000e+01 : f32
    %55 = vector.broadcast %cst_25 : f32 to vector<8x1xf32>
    %56 = arith.divf %54, %55 : vector<8x1xf32>
    %57 = vector.broadcast %56 : vector<8x1xf32> to vector<8x32xf32>
    %58 = arith.subf %52, %57 : vector<8x32xf32>
    %59 = arith.mulf %58, %58 : vector<8x32xf32>
    %cst_26 = arith.constant dense<0.000000e+00> : vector<8xf32>
    %60 = vector.multi_reduction <add>, %59, %cst_26 [1] : vector<8x32xf32> to vector<8xf32>
    %61 = vector.shape_cast %60 : vector<8xf32> to vector<8x1xf32>
    %cst_27 = arith.constant 3.200000e+01 : f32
    %62 = vector.broadcast %cst_27 : f32 to vector<8x1xf32>
    %63 = arith.divf %61, %62 : vector<8x1xf32>
    %64 = vector.broadcast %56 : vector<8x1xf32> to vector<8x32xf32>
    %65 = arith.subf %52, %64 : vector<8x32xf32>
    %cst_28 = arith.constant 9.99999974E-6 : f32
    %66 = vector.broadcast %cst_28 : f32 to vector<8x1xf32>
    %67 = arith.addf %63, %66 : vector<8x1xf32>
    %68 = math.rsqrt %67 : vector<8x1xf32>
    %69 = vector.broadcast %68 : vector<8x1xf32> to vector<8x32xf32>
    %70 = arith.mulf %65, %69 : vector<8x32xf32>
    %71 = vector.broadcast %6 : vector<1x32xf32> to vector<8x32xf32>
    %72 = arith.mulf %70, %71 : vector<8x32xf32>
    %73 = vector.broadcast %7 : vector<1x32xf32> to vector<8x32xf32>
    %74 = arith.addf %72, %73 : vector<8x32xf32>
    %c0_29 = arith.constant 0 : index
    %c0_30 = arith.constant 0 : index
    %75 = vector.load %arg5[%c0_29, %c0_30] : memref<32x48xf32, #tpu.memory_space<vmem>>, vector<32x48xf32>
    %cst_31 = arith.constant dense<0.000000e+00> : vector<8x48xf32>
    %76 = tpu.matmul %74, %75, %cst_31 {dimension_numbers = #tpu.dot_dimension_numbers<[1], [0], [0], [1], [0, 0, 1, 1], [], []>} : vector<8x32xf32>, vector<32x48xf32>, vector<8x48xf32> -> vector<8x48xf32>
    %77 = vector.broadcast %3 : vector<1x48xf32> to vector<8x48xf32>
    %78 = arith.addf %76, %77 : vector<8x48xf32>
    %c0_32 = arith.constant 0 : index
    %c0_33 = arith.constant 0 : index
    %c0_34 = arith.constant 0 : index
    %79 = vector.load %arg20[%c0_32, %c0_33, %c0_34] : memref<1x8x48xf32, #tpu.memory_space<vmem>>, vector<1x8x48xf32>
    %80 = vector.shape_cast %79 : vector<1x8x48xf32> to vector<8x48xf32>
    %81 = vector.shape_cast %78 : vector<8x48xf32> to vector<1x8x48xf32>
    tpu.vector_store %arg20[%c0_32, %c0_33, %c0_34], %81 {strides = array<i32>} : memref<1x8x48xf32, #tpu.memory_space<vmem>>, vector<1x8x48xf32>,
    return
  }
  func.func @transform_0(%arg0: i32) -> (i32, i32, i32) {
    %c0_i32 = arith.constant 0 : i32
    %c0_i32_0 = arith.constant 0 : i32
    %c0_i32_1 = arith.constant 0 : i32
    return %arg0, %c0_i32, %c0_i32_0 : i32, i32, i32
  }
  func.func @transform_1(%arg0: i32) -> (i32, i32, i32) {
    %c0_i32 = arith.constant 0 : i32
    %c0_i32_0 = arith.constant 0 : i32
    %c0_i32_1 = arith.constant 0 : i32
    return %arg0, %c0_i32, %c0_i32_0 : i32, i32, i32
  }
  func.func @transform_2(%arg0: i32) -> (i32, i32) {
    %c0_i32 = arith.constant 0 : i32
    %c0_i32_0 = arith.constant 0 : i32
    %c0_i32_1 = arith.constant 0 : i32
    return %c0_i32, %c0_i32_0 : i32, i32
  }
  func.func @transform_3(%arg0: i32) -> (i32, i32) {
    %c0_i32 = arith.constant 0 : i32
    %c0_i32_0 = arith.constant 0 : i32
    %c0_i32_1 = arith.constant 0 : i32
    return %c0_i32, %c0_i32_0 : i32, i32
  }
  func.func @transform_4(%arg0: i32) -> (i32, i32) {
    %c0_i32 = arith.constant 0 : i32
    %c0_i32_0 = arith.constant 0 : i32
    %c0_i32_1 = arith.constant 0 : i32
    return %c0_i32, %c0_i32_0 : i32, i32
  }
  func.func @transform_5(%arg0: i32) -> (i32, i32) {
    %c0_i32 = arith.constant 0 : i32
    %c0_i32_0 = arith.constant 0 : i32
    %c0_i32_1 = arith.constant 0 : i32
    return %c0_i32, %c0_i32_0 : i32, i32
  }
  func.func @transform_6(%arg0: i32) -> (i32, i32, i32) {
    %c0_i32 = arith.constant 0 : i32
    %c0_i32_0 = arith.constant 0 : i32
    %c0_i32_1 = arith.constant 0 : i32
    %c0_i32_2 = arith.constant 0 : i32
    return %c0_i32, %c0_i32_0, %c0_i32_1 : i32, i32, i32
  }
  func.func @transform_7(%arg0: i32) -> (i32, i32, i32) {
    %c0_i32 = arith.constant 0 : i32
    %c0_i32_0 = arith.constant 0 : i32
    %c0_i32_1 = arith.constant 0 : i32
    %c0_i32_2 = arith.constant 0 : i32
    return %c0_i32, %c0_i32_0, %c0_i32_1 : i32, i32, i32
  }
  func.func @transform_8(%arg0: i32) -> (i32, i32, i32) {
    %c0_i32 = arith.constant 0 : i32
    %c0_i32_0 = arith.constant 0 : i32
    %c0_i32_1 = arith.constant 0 : i32
    %c0_i32_2 = arith.constant 0 : i32
    return %c0_i32, %c0_i32_0, %c0_i32_1 : i32, i32, i32
  }
  func.func @transform_9(%arg0: i32) -> (i32, i32, i32) {
    %c0_i32 = arith.constant 0 : i32
    %c0_i32_0 = arith.constant 0 : i32
    %c0_i32_1 = arith.constant 0 : i32
    %c0_i32_2 = arith.constant 0 : i32
    return %c0_i32, %c0_i32_0, %c0_i32_1 : i32, i32, i32
  }
  func.func @transform_10(%arg0: i32) -> (i32, i32, i32) {
    %c0_i32 = arith.constant 0 : i32
    %c0_i32_0 = arith.constant 0 : i32
    %c0_i32_1 = arith.constant 0 : i32
    %c0_i32_2 = arith.constant 0 : i32
    return %c0_i32, %c0_i32_0, %c0_i32_1 : i32, i32, i32
  }
  func.func @transform_11(%arg0: i32) -> (i32, i32, i32) {
    %c0_i32 = arith.constant 0 : i32
    %c0_i32_0 = arith.constant 0 : i32
    %c0_i32_1 = arith.constant 0 : i32
    %c0_i32_2 = arith.constant 0 : i32
    return %c0_i32, %c0_i32_0, %c0_i32_1 : i32, i32, i32
  }
  func.func @transform_12(%arg0: i32) -> (i32, i32, i32) {
    %c0_i32 = arith.constant 0 : i32
    %c0_i32_0 = arith.constant 0 : i32
    %c0_i32_1 = arith.constant 0 : i32
    %c0_i32_2 = arith.constant 0 : i32
    return %c0_i32, %c0_i32_0, %c0_i32_1 : i32, i32, i32
  }
  func.func @transform_13(%arg0: i32) -> (i32, i32, i32) {
    %c0_i32 = arith.constant 0 : i32
    %c0_i32_0 = arith.constant 0 : i32
    %c0_i32_1 = arith.constant 0 : i32
    %c0_i32_2 = arith.constant 0 : i32
    return %c0_i32, %c0_i32_0, %c0_i32_1 : i32, i32, i32
  }
  func.func @transform_14(%arg0: i32) -> (i32, i32, i32) {
    %c0_i32 = arith.constant 0 : i32
    %c0_i32_0 = arith.constant 0 : i32
    %c0_i32_1 = arith.constant 0 : i32
    %c0_i32_2 = arith.constant 0 : i32
    return %c0_i32, %c0_i32_0, %c0_i32_1 : i32, i32, i32
  }
  func.func @transform_15(%arg0: i32) -> (i32, i32, i32) {
    %c0_i32 = arith.constant 0 : i32
    %c0_i32_0 = arith.constant 0 : i32
    %c0_i32_1 = arith.constant 0 : i32
    %c0_i32_2 = arith.constant 0 : i32
    return %c0_i32, %c0_i32_0, %c0_i32_1 : i32, i32, i32
  }
  func.func @transform_16(%arg0: i32) -> (i32, i32, i32) {
    %c0_i32 = arith.constant 0 : i32
    %c0_i32_0 = arith.constant 0 : i32
    %c0_i32_1 = arith.constant 0 : i32
    %c0_i32_2 = arith.constant 0 : i32
    return %c0_i32, %c0_i32_0, %c0_i32_1 : i32, i32, i32
  }
  func.func @transform_17(%arg0: i32) -> (i32, i32, i32) {
    %c0_i32 = arith.constant 0 : i32
    %c0_i32_0 = arith.constant 0 : i32
    %c0_i32_1 = arith.constant 0 : i32
    %c0_i32_2 = arith.constant 0 : i32
    return %c0_i32, %c0_i32_0, %c0_i32_1 : i32, i32, i32
  }
  func.func @transform_18(%arg0: i32) -> (i32, i32, i32) {
    %c0_i32 = arith.constant 0 : i32
    %c0_i32_0 = arith.constant 0 : i32
    %c0_i32_1 = arith.constant 0 : i32
    %c0_i32_2 = arith.constant 0 : i32
    return %c0_i32, %c0_i32_0, %c0_i32_1 : i32, i32, i32
  }
  func.func @transform_19(%arg0: i32) -> (i32, i32, i32) {
    %c0_i32 = arith.constant 0 : i32
    %c0_i32_0 = arith.constant 0 : i32
    %c0_i32_1 = arith.constant 0 : i32
    return %arg0, %c0_i32, %c0_i32_0 : i32, i32, i32
  }
}

</mosaic_0001>

<bundles_post_ra>
// kernel: transformer_model2_forward.1
= control target key start
LH: loop header
LB: loop body
LE: loop exit
PB: predicated region body
PF: predicated region fallthrough
CT: control target
= control target key end

     0   :  { %s3352_s0 = inlined_call_operand.vmem [shape: f32[2,8,24], index: 0, kind: input, shape index: {}]   ;;  %s3353_s1 = inlined_call_operand.vmem [shape: f32[2,8,24], index: 1, kind: input, shape index: {}]   ;;  %s3354_s2 = inlined_call_operand.vmem [shape: f32[8,32], index: 2, kind: input, shape index: {}]   ;;  %s3355_s3 = inlined_call_operand.vmem [shape: f32[24,32], index: 3, kind: input, shape index: {}]   ;;  %s3356_s4 = inlined_call_operand.vmem [shape: f32[32,48], index: 4, kind: input, shape index: {}]   ;;  %s3357_s5 = inlined_call_operand.vmem [shape: f32[6,128], index: 5, kind: input, shape index: {}]   ;;  %s3358_s6 = inlined_call_operand.vmem [shape: f32[2,32,96], index: 6, kind: input, shape index: {}]   ;;  %s3359_s7 = inlined_call_operand.vmem [shape: f32[2,32,32], index: 7, kind: input, shape index: {}]   ;;  %s3360_s8 = inlined_call_operand.vmem [shape: f32[2,32,64], index: 8, kind: input, shape index: {}]   ;;  %s3361_s9 = inlined_call_operand.vmem [shape: f32[2,64,32], index: 9, kind: input, shape index: {}]   ;;  %s3362_s10 = inlined_call_operand.vmem [shape: f32[2,8,128], index: 10, kind: input, shape index: {}]   ;;  %s3363_s11 = inlined_call_operand.vmem [shape: f32[2,32,96], index: 11, kind: input, shape index: {}]   ;;  %s3364_s12 = inlined_call_operand.vmem [shape: f32[2,32,32], index: 12, kind: input, shape index: {}]   ;;  %s3365_s13 = inlined_call_operand.vmem [shape: f32[2,32,32], index: 13, kind: input, shape index: {}]   ;;  %s3366_s14 = inlined_call_operand.vmem [shape: f32[2,32,64], index: 14, kind: input, shape index: {}]   ;;  %s3367_s15 = inlined_call_operand.vmem [shape: f32[2,32,32], index: 15, kind: input, shape index: {}]   ;;  %s3368_s16 = inlined_call_operand.vmem [shape: f32[2,32,64], index: 16, kind: input, shape index: {}]   ;;  %s3369_s17 = inlined_call_operand.vmem [shape: f32[2,64,32], index: 17, kind: input, shape index: {}]   ;;  %s3370_s18 = inlined_call_operand.vmem [shape: f32[2,13,128], index: 18, kind: input, shape index: {}]   ;;  %s3371_s19 = inlined_call_operand.hbm [shape: f32[2,8,48], index: 19, kind: output, shape index: {}]  }
   0x1   :  { %3388 = sst [smem:[#allocation13_spill]] %s3352_s0 }
   0x2   :  { %3389 = sst [smem:[#allocation14_spill]] %s3353_s1 }
   0x3   :  { %3390 = sst [smem:[#allocation15_spill]] %s3354_s2 }
   0x4   :  { %3391 = sst [smem:[#allocation16_spill]] %s3355_s3 }
   0x5   :  { %3392 = sst [smem:[#allocation17_spill]] %s3356_s4 }
   0x6   :  { %3393 = sst [smem:[#allocation18_spill]] %s3371_s19 }
   0x7   :  { %24 = vsyncpa [#allocation3], 0 }
   0x8   :  { %26 = vsyncpa [#allocation3 + $0x1], 0  ;;  %s2835_s0 = smov 0   ;;  %s2837_s30 = smov 0  }
   0x9   :  { %s2839_s20 = smov 0   ;;  %s2841_s21 = smov 0  }
   0xa LB: > { %3394 = sst [smem:[#allocation5_spill]] %s2675_s0  ;;  %s2856_s1 = sadd.s32 4294967295, %s2687_s21   ;;  %s2687_s21 = sphi %s2841_s21, %s3424_s21   ;;  %s2683_s20 = sphi %s2839_s20, %s3427_s20   ;;  %s2679_s30 = sphi %s2837_s30, %s3426_s30   ;;  %s2675_s0 = sphi %s2835_s0, %s3425_s0  }
   0xb   : > { %3395 = sst [smem:[#allocation6_spill]] %s2679_s30  ;;  %s2377_s22 = sadd.s32 4294967294, %s2687_s21  }
   0xc   : > { %3396 = sst [smem:[#allocation7_spill]] %s2683_s20  ;;  %s2860_s2 = sadd.s32 1, %s2687_s21  }
   0xd   : > { %3397 = sst [smem:[#allocation8_spill]] %s2687_s21  ;;  %s448_s23 = sadd.s32 1, %s2683_s20 }
   0xe   : > { %3398 = sst [smem:[#allocation9_spill]] %s2860_s2  ;;  %s445_s24 = ssub.s32 %s2687_s21, %s2860_s2 }
   0xf   : > { %p458_p0 = scmp.ne.s32.totalorder %s2683_s20, %s2679_s30  ;;  %p446_p1 = scmp.eq.s32.totalorder %s445_s24, 0 }
  0x10   : > { %p459_p2 = scmp.eq.s32.totalorder %s2856_s1, 1  ;;  %p464_p3 = scmp.ne.s32.totalorder %s2679_s30, %s2675_s0 }
  0x11   : > { %p465_p4 = scmp.eq.s32.totalorder %s2377_s22, 1  ;;  %p2380_p7 = scmp.ge.s32.totalorder %s2687_s21, 1 }
  0x12   : > { %s2871_s25 = scalar_select %p446_p1, %s2683_s20, %s448_s23  }
  0x13   : > { %p2873_p5 = por %p459_p2, %p458_p0  ;;  %p2877_p6 = por %p465_p4, %p464_p3 }
  0x14   : > { %3399 = sst [smem:[#allocation10_spill]] %s2871_s25  ;;  %p548_p8 = scmp.lt.s32.totalorder %s2687_s21, 3 }
  0x15   : > { %s3400_s3 = scalar_select %p2873_p5, 1, 0 }
  0x16   : > { %s3402_s26 = scalar_select %p2877_p6, 1, 0 }
  0x17   : > { %3401 = sst [smem:[#allocation11_spill]] %s3400_s3  ;;  %p549_p9 = pnand %p2380_p7, %p548_p8 }
  0x18   : > { %3403 = sst [smem:[#allocation12_spill]] %s3402_s26  ;;  %s3377_s27 = sand.u32 (!%p549_p9), 1, %s2679_s30  }
  0x19   : > { %552 = sbr.rel (%p549_p9) target bundleno = 6250 (0x186a), region = 96  ;;  %s3404_s22 = sld [smem:[#allocation16_spill]] (!%p549_p9) }
  0x1a   : > { %p607_p10 = scmp.lt.s32.totalorder (!%p549_p9), %s2856_s1, 1  ;;  %s2897_s25 = sshll.u32 (!%p549_p9), %s3377_s27, 3 }
  0x1b   : > { %s3405_s26 = sld [smem:[#allocation13_spill]] (!%p549_p9)  ;;  %s2934_s21 = smov (!%p549_p9), 0  }
  0x1c   : > { %s3406_s3 = sld [smem:[#allocation14_spill]] (!%p549_p9) }
  0x1d   : > { %s3407_s30 = sld [smem:[#allocation15_spill]] (!%p549_p9) }
  0x1e   : > { %s608_s28 = scalar_select %p607_p10, %s2856_s1, 1  ;;  %vm622_vm0 = vcmask 195584   ;;  %v2920_v4 = vld [vmem:[%s3357_s5] sm:$0x3f] }
  0x1f   : > { %v2887_v0 = vld [vmem:[%s3404_s22 + $0x10] sm:$0xff]  ;;  %v2892_v1 = vld [vmem:[%s3404_s22 + $0x8] sm:$0xff]  ;;  %v2903_v2 = vld [vmem:[%s3404_s22] sm:$0xff]  ;;  %v621_v5 = vperm.slane %v2920_v4, 0 }
  0x20   : > { %639 = vmatpush.msra.mxu0 %v2887_v0  ;;  %s2382_s29 = sshll.u32 %s608_s28, 3 }
  0x21   : > { %s610_s27 = scalar_lea.vmem %s3405_s26, %s2382_s29 }
  0x22   : > { %640 = vmatpush.msra.mxu0 %v2892_v1  ;;  %s2914_s19 = scalar_lea.vmem %s3406_s3, %s2382_s29  ;;  %v620_v3 = vld [vmem:[%s610_s27] sm:$0xff] }
  0x23   : > { %v2926_v6 = vld [vmem:[%s3407_s30] sm:$0xff] }
  0x24   : > { %641 = vmatpush.msra.mxu0 %v2903_v2 }
  0x25   : > { %2384 = vmatmul.msk.f32.vlgmr.msra.gmra.mxu0 %vm622_vm0, %v620_v3 }
  0xa2   : > { %v643_v7 = vpop.f32.mrf.mxu0 }
  0xa3   : > { %v644_v8 = vadd.f32 %v643_v7, %v621_v5 }
  0xa5   : > { %v646_v9 = vadd.f32 %v644_v8, %v2926_v6  }
  0xa6 LB: >> { %s2943_s30 = sshll.u32 %s2695_s21, 5  ;;  %vm664_vm1 = vcmask 261120   ;;  %s2385_s22 = sshll.u32 %s2695_s21, 3  ;;  %vm696_vm2 = vcmask 64512   ;;  %s2695_s21 = sphi %s2934_s21, %s652_s21   ;;  %v2691_v9 = vphi %v646_v9, %v3408_v9  }
  0xa7   : >> { %s658_s27 = scalar_lea.vmem %s3358_s6, %s2943_s30  ;;  %s655_s24 = scalar_lea.vmem %s3362_s10, %s2385_s22 }
  0xa8   : >> { %v662_v10 = vld [vmem:[%s658_s27 + $0x18] sm:$0xff]  ;;  %v661_v11 = vld [vmem:[%s658_s27 + $0x10] sm:$0xff]  ;;  %v660_v12 = vld [vmem:[%s658_s27 + $0x8] sm:$0xff]  ;;  %s2705_s20 = smov 64   ;;  %s2706_s2 = smov 120  }
  0xa9   : >> { %680 = vmatpush.msra.mxu0 %v662_v10  ;;  %v659_v13 = vld [vmem:[%s658_s27] sm:$0xff]  ;;  %s2707_s28 = smov 96   ;;  %s2708_s3 = smov 56  }
  0xaa   : >> { %v2955_v14 = vld [vmem:[%s655_s24] sm:$0xff]  ;;  %s2709_s26 = smov 88   ;;  %s2710_s27 = smov 104  }
  0xab   : >> { %681 = vmatpush.msra.mxu0 %v661_v11  ;;  %v663_v15 = vperm.slane %v2955_v14, 0  ;;  %s2711_s22 = smov 72   ;;  %s2712_s29 = smov 80  }
  0xac   : >> { %s2713_s23 = smov 112   ;;  %s2714_s24 = smov 40  }
  0xad   : >> { %682 = vmatpush.msra.mxu0 %v660_v12 }
  0xaf   : >> { %683 = vmatpush.msra.mxu0 %v659_v13 }
  0xb0   : >> { %2387 = vmatmul.msk.f32.vlgmr.msra.gmra.mxu0 %vm664_vm1, %v2691_v9 }
 0x12d   : >> { %v685_v16 = vpop.f32.mrf.mxu0 }
 0x12e   : >> { %v2958_v17 = vadd.f32 %v685_v16, %v663_v15 }
 0x130   : >> { %745 = vrot.lane.b32.xlu2 %v2958_v17, %s2705_s20  ;;  %771 = vrot.lane.b32.xlu1 %v2958_v17, %s2706_s2  ;;  %s2715_s20 = smov 8   ;;  %s2716_s2 = smov 48  }
 0x131   : >> { %694 = vrot.lane.b32.xlu0 %v2958_v17, %s2707_s28  ;;  %s2717_s28 = smov 16  }
 0x138   : >> { %823 = vrot.lane.b32.xlu2 %v2958_v17, %s2708_s3  ;;  %s2718_s3 = smov 24  }
 0x139   : >> { %773 = vrot.lane.b32.xlu0 %v2958_v17, %s2709_s26 }
 0x18a   : >> { %v746_v18 = vpop.permute.xlu2 %745 }
 0x18b   : >> { %766 = vmatpush.msra.mxu2 %v746_v18 }
 0x192   : >> { %v824_v19 = vpop.permute.xlu2 %823 }
 0x193   : >> { %844 = vmatpush.msrb.mxu2 %v824_v19 }
 0x1a2   : >> { %v772_v22 = vpop.permute.xlu1 %771 }
 0x1a3   : >> { %v695_v20 = vpop.permute.xlu0 %694 }
 0x1a4   : >> { %2388 = vmatpush.xpose.msk.msra.mxu1 %vm696_vm2, %v695_v20 }
 0x1a7   : >> { %2389 = vmatmul.msk.f32.vlgmr.msra.gmra.mxu1 %vm696_vm2, %v2958_v17 }
 0x1ab   : >> { %v774_v21 = vpop.permute.xlu0 %773 }
 0x1ac   : >> { %2391 = vmatpush.xpose.msk.msra.mxu3 %vm696_vm2, %v774_v21 }
 0x1af   : >> { %2392 = vmatmul.msk.f32.vlgmr.msra.gmra.mxu3 %vm696_vm2, %v772_v22 }
 0x224   : >> { %v718_v23 = vpop.f32.mrf.mxu1 }
 0x225   : >> { %v721_v24 = vsel %vm696_vm2, %v718_v23, -inf }
 0x226   : >> { %722 = vmax.xlane.f32.xlu1 %v721_v24 }
 0x232   : >> { %v796_v25 = vpop.f32.mrf.mxu3 }
 0x233   : >> { %v799_v26 = vsel %vm696_vm2, %v796_v25, -inf }
 0x234   : >> { %800 = vmax.xlane.f32.xlu2 %v799_v26 }
 0x23f   : >> { %927 = vrot.lane.b32.xlu1 %v2958_v17, %s2710_s27 }
 0x24c   : >> { %929 = vrot.lane.b32.xlu2 %v2958_v17, %s2711_s22  ;;  %s688_s22 = scalar_lea.vmem %s3359_s7, %s2943_s30 }
 0x299   : >> { %v723_v27 = vpop.xlane.xlu1 %722 }
 0x29a   : >> { %v724_v28 = vsub.f32 %v718_v23, %v723_v27 }
 0x29c   : >> { %v725_v29 = vmul.f32 1.442695, %v724_v28 }
 0x29e   : >> { %2545 = vpow2.f32 %v725_v29 }
 0x2a4   : >> { %v2546_v30 = vpop.eup %2545 }
 0x2a5   : >> { %v727_v31 = vsel %vm696_vm2, %v2546_v30, 0.0 }
 0x2a6   : >> { %728 = vadd.xlane.f32.xlu2 %v727_v31 }
 0x2a7   : >> { %v801_v32 = vpop.xlane.xlu2 %800 }
 0x2a8   : >> { %v802_v33 = vsub.f32 %v796_v25, %v801_v32 }
 0x2aa   : >> { %v803_v34 = vmul.f32 1.442695, %v802_v33 }
 0x2ac   : >> { %2547 = vpow2.f32 %v803_v34 }
 0x2af   : >> { %v930_v37 = vpop.permute.xlu2 %929 }
 0x2b1   : >> { %v928_v3 = vpop.permute.xlu1 %927 }
 0x2b2   : >> { %v2548_v35 = vpop.eup %2547 }
 0x2b3   : >> { %v805_v36 = vsel %vm696_vm2, %v2548_v35, 0.0 }
 0x2b4   : >> { %806 = vadd.xlane.f32.xlu0 %v805_v36 }
 0x2be   : >> { %851 = vrot.lane.b32.xlu2 %v2958_v17, %s2712_s29 }
 0x2c8   : >> { %849 = vrot.lane.b32.xlu0 %v2958_v17, %s2713_s23 }
 0x319   : >> { %v729_v38 = vpop.xlane.xlu2 %728 }
 0x31a   : >> { %2549 = vrcp.f32 %v729_v38  ;;  %v741_v43 = vand.u32 2147483648, %v729_v38  ;;  %v739_v45 = vand.u32 2147483647, %v729_v38  ;;  %vm735_vm4 = vweird.f32 %v729_v38 }
 0x31c   : >> { %v742_v48 = vor.u32 1.1754944e-38, %v741_v43  ;;  %vm740_vm6 = vcmp.eq.f32.partialorder %v739_v45, 8.507059e+37 }
 0x320   : >> { %v2550_v39 = vpop.eup %2549 }
 0x321   : >> { %v731_v40 = vmul.f32 %v2550_v39, %v729_v38  ;;  %v852_v41 = vpop.permute.xlu2 %851  ;;  %vm736_vm3 = vweird.f32 %v2550_v39 }
 0x322   : >> { %2394 = vmatpush.xpose.msk.msrb.mxu1 %vm696_vm2, %v852_v41  ;;  %vm737_vm5 = vmor %vm735_vm4, %vm736_vm3 }
 0x323   : >> { %v732_v42 = vsub.f32 1.0, %v731_v40 }
 0x325   : >> { %v733_v44 = vmul.f32 %v2550_v39, %v732_v42 }
 0x327   : >> { %v807_v46 = vpop.xlane.xlu0 %806  ;;  %v734_v47 = vadd.f32 %v2550_v39, %v733_v44 }
 0x328   : >> { %2551 = vrcp.f32 %v807_v46  ;;  %v819_v55 = vand.u32 2147483648, %v807_v46  ;;  %v817_v57 = vand.u32 2147483647, %v807_v46  ;;  %vm813_vm8 = vweird.f32 %v807_v46 }
 0x329   : >> { %v738_v49 = vsel %vm737_vm5, %v2550_v39, %v734_v47 }
 0x32a   : >> { %v743_v50 = vsel %vm740_vm6, %v742_v48, %v738_v49  ;;  %v820_v59 = vor.u32 1.1754944e-38, %v819_v55  ;;  %vm818_vm10 = vcmp.eq.f32.partialorder %v817_v57, 8.507059e+37  ;;  %v690_v55 = vld [vmem:[%s688_s22 + $0x8] sm:$0xff]  ;;  %vm1018_vm6 = vcmask 130048  }
 0x32b   : >> { %v744_v51 = vmul.f32 %v2546_v30, %v743_v50 }
 0x32d   : >> { %2390 = vmatmul.msk.f32.vlgmr.msra.gmra.mxu2 %vm696_vm2, %v744_v51 }
 0x32e   : >> { %v2552_v52 = vpop.eup %2551  ;;  %2397 = vmatpush.xpose.msk.msra.mxu2 %vm696_vm2, %v930_v37 }
 0x32f   : >> { %v809_v53 = vmul.f32 %v2552_v52, %v807_v46  ;;  %vm814_vm7 = vweird.f32 %v2552_v52 }
 0x330   : >> { %vm815_vm9 = vmor %vm813_vm8, %vm814_vm7 }
 0x331   : >> { %v810_v54 = vsub.f32 1.0, %v809_v53  ;;  %v692_v53 = vld [vmem:[%s688_s22 + $0x18] sm:$0xff] }
 0x332   : >> { %1037 = vmatpush.msra.mxu1 %v692_v53 }
 0x333   : >> { %v811_v56 = vmul.f32 %v2552_v52, %v810_v54  ;;  %v691_v54 = vld [vmem:[%s688_s22 + $0x10] sm:$0xff] }
 0x334   : >> { %1038 = vmatpush.msra.mxu1 %v691_v54  ;;  %v1119_v54 = vperm.slane %v2955_v14, 3 }
 0x335   : >> { %v812_v58 = vadd.f32 %v2552_v52, %v811_v56  ;;  %v689_v56 = vld [vmem:[%s688_s22] sm:$0xff] }
 0x336   : >> { %1039 = vmatpush.msra.mxu1 %v690_v55 }
 0x337   : >> { %v816_v60 = vsel %vm815_vm9, %v2552_v52, %v812_v58 }
 0x338   : >> { %v821_v61 = vsel %vm818_vm10, %v820_v59, %v816_v60  ;;  %1040 = vmatpush.msra.mxu1 %v689_v56 }
 0x339   : >> { %v822_v62 = vmul.f32 %v2548_v35, %v821_v61 }
 0x33a   : >> { %v850_v63 = vpop.permute.xlu0 %849 }
 0x33b   : >> { %2393 = vmatmul.msk.f32.vlgmr.msrb.gmra.mxu2 %vm696_vm2, %v822_v62  ;;  %2395 = vmatmul.msk.f32.vlgmr.msrb.gmra.mxu1 %vm696_vm2, %v850_v63  ;;  %v1021_v63 = vperm.slane %v2955_v14, 1 }
 0x343   : >> { %2398 = vmatmul.msk.f32.vlgmr.msra.gmra.mxu2 %vm696_vm2, %v928_v3 }
 0x3b0   : >> { %v2984_v7 = vpop.f32.mrf.mxu2 }
 0x3b8   : >> { %v874_v8 = vpop.f32.mrf.mxu1 }
 0x3b9   : >> { %v877_v10 = vsel %vm696_vm2, %v874_v8, -inf }
 0x3ba   : >> { %878 = vmax.xlane.f32.xlu2 %v877_v10 }
 0x3be   : >> { %v846_v11 = vpop.f32.mrf.mxu2 }
 0x3c6   : >> { %v952_v12 = vpop.f32.mrf.mxu2 }
 0x3c7   : >> { %v955_v13 = vsel %vm696_vm2, %v952_v12, -inf }
 0x3c8   : >> { %956 = vmax.xlane.f32.xlu1 %v955_v13 }
 0x3e1   : >> { %979 = vrot.lane.b32.xlu1 %v2958_v17, %s2714_s24  ;;  %s1079_s24 = scalar_lea.vmem %s3360_s8, %s2943_s30 }
 0x42d   : >> { %v879_v15 = vpop.xlane.xlu2 %878 }
 0x42e   : >> { %v880_v16 = vsub.f32 %v874_v8, %v879_v15 }
 0x430   : >> { %v881_v18 = vmul.f32 1.442695, %v880_v16 }
 0x432   : >> { %2553 = vpow2.f32 %v881_v18 }
 0x438   : >> { %v2554_v19 = vpop.eup %2553 }
 0x439   : >> { %v883_v20 = vsel %vm696_vm2, %v2554_v19, 0.0 }
 0x43a   : >> { %884 = vadd.xlane.f32.xlu0 %v883_v20 }
 0x43b   : >> { %v957_v21 = vpop.xlane.xlu1 %956 }
 0x43c   : >> { %v958_v22 = vsub.f32 %v952_v12, %v957_v21  ;;  %v2719_v12 = vmov 32.0  }
 0x43e   : >> { %v959_v23 = vmul.f32 1.442695, %v958_v22 }
 0x440   : >> { %2555 = vpow2.f32 %v959_v23 }
 0x446   : >> { %v2556_v24 = vpop.eup %2555 }
 0x447   : >> { %v961_v25 = vsel %vm696_vm2, %v2556_v24, 0.0 }
 0x448   : >> { %962 = vadd.xlane.f32.xlu2 %v961_v25  ;;  %v1082_v25 = vld [vmem:[%s1079_s24 + $0x10] sm:$0xff] }
 0x44e   : >> { %1006 = vrot.lane.b32.xlu0 %v846_v11, %s2715_s20  ;;  %s2402_s20 = sshll.u32 %s2695_s21, 6  ;;  %s652_s21 = sadd.s32 1, %s2695_s21  }
 0x44f   : >> { %p649_p11 = scmp.ge.s32.totalorder %s652_s21, 2  }
 0x453   : >> { %v980_v26 = vpop.permute.xlu1 %979 }
 0x454   : >> { %1000 = vmatpush.msrb.mxu2 %v980_v26  ;;  %v1081_v26 = vld [vmem:[%s1079_s24 + $0x8] sm:$0xff] }
 0x460   : >> { %901 = vrot.lane.b32.xlu2 %v2958_v17, %s2716_s2 }
 0x4ad   : >> { %v885_v27 = vpop.xlane.xlu0 %884 }
 0x4ae   : >> { %2557 = vrcp.f32 %v885_v27  ;;  %v897_v32 = vand.u32 2147483648, %v885_v27  ;;  %vm891_vm12 = vweird.f32 %v885_v27  ;;  %v895_v34 = vand.u32 2147483647, %v885_v27 }
 0x4b0   : >> { %v898_v37 = vor.u32 1.1754944e-38, %v897_v32  ;;  %vm896_vm14 = vcmp.eq.f32.partialorder %v895_v34, 8.507059e+37 }
 0x4b4   : >> { %v2558_v28 = vpop.eup %2557 }
 0x4b5   : >> { %v887_v29 = vmul.f32 %v2558_v28, %v885_v27  ;;  %vm892_vm11 = vweird.f32 %v2558_v28  ;;  %v1080_v27 = vld [vmem:[%s1079_s24] sm:$0xff] }
 0x4b6   : >> { %vm893_vm13 = vmor %vm891_vm12, %vm892_vm11  ;;  %vm1120_vm11 = vcmask 523264  }
 0x4b7   : >> { %v888_v30 = vsub.f32 1.0, %v887_v29 }
 0x4b9   : >> { %v889_v31 = vmul.f32 %v2558_v28, %v888_v30 }
 0x4bb   : >> { %v890_v33 = vadd.f32 %v2558_v28, %v889_v31  ;;  %v963_v35 = vpop.xlane.xlu2 %962 }
 0x4bc   : >> { %2559 = vrcp.f32 %v963_v35  ;;  %v975_v43 = vand.u32 2147483648, %v963_v35  ;;  %v973_v45 = vand.u32 2147483647, %v963_v35  ;;  %vm969_vm3 = vweird.f32 %v963_v35 }
 0x4bd   : >> { %v894_v36 = vsel %vm893_vm13, %v2558_v28, %v890_v33  ;;  %2561 = vrcp.f32 %v2719_v12 }
 0x4be   : >> { %v899_v38 = vsel %vm896_vm14, %v898_v37, %v894_v36  ;;  %v976_v47 = vor.u32 1.1754944e-38, %v975_v43  ;;  %vm974_vm5 = vcmp.eq.f32.partialorder %v973_v45, 8.507059e+37 }
 0x4bf   : >> { %v900_v41 = vmul.f32 %v2554_v19, %v899_v38 }
 0x4c0   : >> { %v1007_v57 = vpop.permute.xlu0 %1006 }
 0x4c1   : >> { %v1017_v59 = vsel %vm696_vm2, %v2984_v7, %v1007_v57 }
 0x4c2   : >> { %v2560_v39 = vpop.eup %2559 }
 0x4c3   : >> { %v965_v17 = vmul.f32 %v2560_v39, %v963_v35  ;;  %v902_v40 = vpop.permute.xlu2 %901  ;;  %vm970_vm15 = vweird.f32 %v2560_v39  ;;  %v2562_v7 = vpop.eup %2561 }
 0x4c4   : >> { %922 = vmatpush.msrb.mxu3 %v902_v40  ;;  %vm971_vm4 = vmor %vm969_vm3, %vm970_vm15  ;;  %v1050_v13 = vmul.f32 32.0, %v2562_v7  ;;  %vm1054_vm7 = vweird.f32 %v2562_v7 }
 0x4c5   : >> { %v966_v42 = vsub.f32 1.0, %v965_v17  ;;  %2396 = vmatmul.msk.f32.vlgmr.msrb.gmra.mxu3 %vm696_vm2, %v900_v41  ;;  %v1075_v41 = vperm.slane %v2955_v14, 4 }
 0x4c6   : >> { %v1051_v15 = vsub.f32 1.0, %v1050_v13 }
 0x4c7   : >> { %v967_v44 = vmul.f32 %v2560_v39, %v966_v42 }
 0x4c8   : >> { %v1052_v16 = vmul.f32 %v2562_v7, %v1051_v15 }
 0x4c9   : >> { %v968_v46 = vadd.f32 %v2560_v39, %v967_v44  ;;  %v1077_v44 = vperm.slane %v2955_v14, 5 }
 0x4ca   : >> { %v1053_v18 = vadd.f32 %v2562_v7, %v1052_v16 }
 0x4cb   : >> { %v972_v48 = vsel %vm971_vm4, %v2560_v39, %v968_v46 }
 0x4cc   : >> { %v977_v49 = vsel %vm974_vm5, %v976_v47, %v972_v48  ;;  %v3006_v19 = vsel %vm1054_vm7, %v2562_v7, %v1053_v18  ;;  %v1167_v18 = vperm.slane %v2955_v14, 6 }
 0x4cd   : >> { %v978_v50 = vmul.f32 %v2556_v24, %v977_v49  ;;  %v1083_v24 = vld [vmem:[%s1079_s24 + $0x18] sm:$0xff] }
 0x4ce   : >> { %1100 = vmatpush.msra.mxu3 %v1083_v24 }
 0x4cf   : >> { %2399 = vmatmul.msk.f32.vlgmr.msrb.gmra.mxu2 %vm696_vm2, %v978_v50  ;;  %v1084_v50 = vperm.slane %v2955_v14, 2 }
 0x4d0   : >> { %1101 = vmatpush.msra.mxu3 %v1082_v25  ;;  %v1211_v25 = vld [vmem:[%s2914_s19] sm:$0xff] (%p649_p11)  ;;  %s3066_s19 = smov (%p649_p11), 0  }
 0x4d2   : >> { %1102 = vmatpush.msra.mxu3 %v1081_v26 }
 0x4d4   : >> { %1103 = vmatpush.msra.mxu3 %v1080_v27 }
 0x548   : >> { %v924_v51 = vpop.f32.mrf.mxu3 }
 0x549   : >> { %1010 = vrot.lane.b32.xlu2 %v924_v51, %s2717_s28 }
 0x552   : >> { %v1002_v52 = vpop.f32.mrf.mxu2 }
 0x553   : >> { %1014 = vrot.lane.b32.xlu0 %v1002_v52, %s2718_s3  ;;  %s3018_s3 = scalar_lea.vmem %s3361_s9, %s2402_s20 }
 0x554   : >> { %v1118_v28 = vld [vmem:[%s3018_s3 + $0x38] sm:$0xff]  ;;  %v1117_v29 = vld [vmem:[%s3018_s3 + $0x30] sm:$0xff]  ;;  %v1116_v30 = vld [vmem:[%s3018_s3 + $0x28] sm:$0xff] }
 0x555   : >> { %1132 = vmatpush.msrb.mxu0 %v1118_v28  ;;  %v1115_v33 = vld [vmem:[%s3018_s3 + $0x20] sm:$0xff]  ;;  %v1114_v35 = vld [vmem:[%s3018_s3 + $0x18] sm:$0xff]  ;;  %v1113_v47 = vld [vmem:[%s3018_s3 + $0x10] sm:$0xff]  ;;  %v2720_v28 = vmov (%p649_p11), -1e+30  }
 0x556   : >> { %v1112_v48 = vld [vmem:[%s3018_s3 + $0x8] sm:$0xff]  ;;  %v1111_v49 = vld [vmem:[%s3018_s3] sm:$0xff] }
 0x557   : >> { %1133 = vmatpush.msrb.mxu0 %v1117_v29 }
 0x559   : >> { %1134 = vmatpush.msrb.mxu0 %v1116_v30 }
 0x55b   : >> { %1135 = vmatpush.msrb.mxu0 %v1115_v33 }
 0x55d   : >> { %1136 = vmatpush.msrb.mxu0 %v1114_v35 }
 0x55f   : >> { %1137 = vmatpush.msrb.mxu0 %v1113_v47 }
 0x561   : >> { %1138 = vmatpush.msrb.mxu0 %v1112_v48 }
 0x563   : >> { %1139 = vmatpush.msrb.mxu0 %v1111_v49 }
 0x565   : > { %1228 = vmatpush.msra.mxu0 (%p649_p11), %v2887_v0 }
 0x567   : > { %1229 = vmatpush.msra.mxu0 (%p649_p11), %v2892_v1 }
 0x569   : > { %1230 = vmatpush.msra.mxu0 (%p649_p11), %v2903_v2 }
 0x5a3   : >> { %v1011_v58 = vpop.permute.xlu2 %1010 }
 0x5a4   : >> { %v1019_v61 = vsel %vm1018_vm6, %v1017_v59, %v1011_v58 }
 0x5c5   : >> { %v1015_v60 = vpop.permute.xlu0 %1014 }
 0x5c6   : >> { %v1020_v62 = vsel %vm622_vm0, %v1019_v61, %v1015_v60 }
 0x5c7   : >> { %2400 = vmatmul.msk.f32.vlgmr.msra.gmra.mxu1 %vm664_vm1, %v1020_v62 }
 0x644   : >> { %v1042_v3 = vpop.f32.mrf.mxu1 }
 0x645   : >> { %v1043_v8 = vadd.f32 %v1042_v3, %v1021_v63 }
 0x647   : >> { %v1045_v10 = vadd.f32 %v2691_v9, %v1043_v8 }
 0x649   : >> { %v1046_v11 = vsel %vm664_vm1, %v1045_v10, 0.0 }
 0x64a   : >> { %1047 = vadd.xlane.f32.xlu1 %v1046_v11 }
 0x6bd   : >> { %v1048_v20 = vpop.xlane.xlu1 %1047 }
 0x6be   : >> { %v1056_v21 = vmul.f32 %v3006_v19, %v1048_v20 }
 0x6c0   : >> { %v1057_v22 = vsub.f32 %v1045_v10, %v1056_v21  ;;  %v1169_v21 = vperm.slane %v2955_v14, 7  ;;  %v1205_v14 = vlaneseq (%p649_p11) }
 0x6c2   : >> { %v1058_v9 = vmul.f32 %v1057_v22, %v1057_v22  ;;  %v1206_v26 = vshrl.u32 (%p649_p11), %v1205_v14, 7  ;;  %v1208_v27 = vand.u32 (%p649_p11), 127, %v1205_v14 }
 0x6c4   : >> { %v1059_v23 = vsel %vm664_vm1, %v1058_v9, 0.0  ;;  %vm1209_vm15 = vcmp.le.s32.totalorder (%p649_p11), %v1208_v27, %v1206_v26 }
 0x6c5   : >> { %1060 = vadd.xlane.f32.xlu2 %v1059_v23  ;;  %v3052_v29 = vsel (%p649_p11), %vm1209_vm15, 0.0, %v2720_v28 }
 0x738   : >> { %v1061_v31 = vpop.xlane.xlu2 %1060 }
 0x739   : >> { %v1062_v32 = vmul.f32 %v1061_v31, %v3006_v19 }
 0x73b   : >> { %v1063_v34 = vadd.f32 1e-05, %v1062_v32 }
 0x73d   : >> { %2563 = vrsqrt.f32 %v1063_v34  ;;  %vm1070_vm9 = vweird.f32 %v1063_v34 }
 0x743   : >> { %v2564_v36 = vpop.eup %2563 }
 0x744   : >> { %v1065_v37 = vmul.f32 %v2564_v36, %v1063_v34  ;;  %vm1071_vm8 = vweird.f32 %v2564_v36 }
 0x745   : >> { %vm1072_vm10 = vmor %vm1070_vm9, %vm1071_vm8 }
 0x746   : >> { %v1066_v38 = vmul.f32 %v2564_v36, %v1065_v37 }
 0x748   : >> { %v1067_v39 = vmul.f32 0.5, %v1066_v38 }
 0x74a   : >> { %v1068_v17 = vsub.f32 1.5, %v1067_v39 }
 0x74c   : >> { %v1069_v40 = vmul.f32 %v2564_v36, %v1068_v17 }
 0x74e   : >> { %v1073_v42 = vsel %vm1072_vm10, %v2564_v36, %v1069_v40 }
 0x74f   : >> { %v1074_v43 = vmul.f32 %v1073_v42, %v1057_v22 }
 0x751   : >> { %v1076_v45 = vmul.f32 %v1075_v41, %v1074_v43  ;;  %v1201_v43 = vperm.slane (%p649_p11), %v2920_v4, 2 }
 0x753   : >> { %v1078_v46 = vadd.f32 %v1077_v44, %v1076_v45 }
 0x755   : >> { %2401 = vmatmul.msk.f32.vlgmr.msra.gmra.mxu3 %vm664_vm1, %v1078_v46 }
 0x7d8   : >> { %v1105_v51 = vpop.f32.mrf.mxu3 }
 0x7d9   : >> { %v1106_v52 = vadd.f32 %v1105_v51, %v1084_v50 }
 0x7db   : >> { %v1108_v53 = vmax.f32 %v1106_v52, 0.0 }
 0x7dd   : >> { %2403 = vmatmul.msk.f32.vlgmr.msrb.gmra.mxu0 %vm1120_vm11, %v1108_v53 }
 0x7e5   : > { %2404 = vmatmul.msk.f32.vlgmr.msra.gmra.mxu0 (%p649_p11), %vm622_vm0, %v1211_v25 }
 0x85a   : >> { %v1141_v55 = vpop.f32.mrf.mxu0 }
 0x85b   : >> { %v1142_v56 = vadd.f32 %v1141_v55, %v1119_v54 }
 0x85d   : >> { %v1144_v57 = vadd.f32 %v1142_v56, %v1078_v46 }
 0x85f   : >> { %v1145_v58 = vsel %vm664_vm1, %v1144_v57, 0.0 }
 0x860   : >> { %1146 = vadd.xlane.f32.xlu0 %v1145_v58 }
 0x862   : > { %v1232_v1 = vpop.f32.mrf.mxu0 (%p649_p11) }
 0x863   : > { %v1233_v2 = vadd.f32 (%p649_p11), %v1232_v1, %v621_v5  ;;  %v1203_v5 = vperm.slane (%p649_p11), %v2920_v4, 3 }
 0x865   : > { %v1235_v34 = vadd.f32 (%p649_p11), %v1233_v2, %v2926_v6  }
 0x8d3   : >> { %v1147_v59 = vpop.xlane.xlu0 %1146 }
 0x8d4   : >> { %v1148_v60 = vmul.f32 %v1147_v59, %v3006_v19 }
 0x8d6   : >> { %v1149_v61 = vsub.f32 %v1144_v57, %v1148_v60 }
 0x8d8   : >> { %v1150_v62 = vmul.f32 %v1149_v61, %v1149_v61 }
 0x8da   : >> { %v1151_v63 = vsel %vm664_vm1, %v1150_v62, 0.0 }
 0x8db   : >> { %1152 = vadd.xlane.f32.xlu1 %v1151_v63 }
 0x94e   : >> { %v1153_v3 = vpop.xlane.xlu1 %1152 }
 0x94f   : >> { %v1154_v8 = vmul.f32 %v1153_v3, %v3006_v19 }
 0x951   : >> { %v1155_v10 = vadd.f32 1e-05, %v1154_v8 }
 0x953   : >> { %2565 = vrsqrt.f32 %v1155_v10  ;;  %vm1162_vm13 = vweird.f32 %v1155_v10 }
 0x959   : >> { %v2566_v11 = vpop.eup %2565 }
 0x95a   : >> { %v1157_v12 = vmul.f32 %v2566_v11, %v1155_v10  ;;  %vm1163_vm12 = vweird.f32 %v2566_v11 }
 0x95b   : >> { %vm1164_vm14 = vmor %vm1162_vm13, %vm1163_vm12 }
 0x95c   : >> { %v1158_v7 = vmul.f32 %v2566_v11, %v1157_v12 }
 0x95e   : >> { %v1159_v13 = vmul.f32 0.5, %v1158_v7 }
 0x960   : >> { %v1160_v15 = vsub.f32 1.5, %v1159_v13 }
 0x962   : >> { %v1161_v16 = vmul.f32 %v2566_v11, %v1160_v15 }
 0x964   : >> { %v1165_v20 = vsel %vm1164_vm14, %v2566_v11, %v1161_v16 }
 0x965   : >> { %v1166_v22 = vmul.f32 %v1165_v20, %v1149_v61 }
 0x967   : >> { %v1168_v9 = vmul.f32 %v1167_v18, %v1166_v22  ;;  %651 = sbr.rel (!%p649_p11) target bundleno = 166 (0xa6), region = 161 }
 0x969   : >> { %v1170_v23 = vadd.f32 %v1169_v21, %v1168_v9  }
 0x96b   : >> { %v3408_v9 = vmov %v1170_v23  ;;  %v1172_v24 = vsel (%p649_p11), %vm664_vm1, %v1170_v23, 0.0 }
 0x96c   : > { %1173 = vadd.xlane.f32.xlu0 %v1172_v24 }
 0x9df   : > { %v1174_v30 = vpop.xlane.xlu0 %1173 }
 0x9e0   : > { %v1182_v31 = vmul.f32 %v1174_v30, %v3006_v19 }
 0x9e2   : > { %v1183_v32 = vsub.f32 %v1170_v23, %v1182_v31 }
 0x9e4   : > { %v1184_v0 = vmul.f32 %v1183_v32, %v1183_v32 }
 0x9e6   : > { %v1185_v33 = vsel %vm664_vm1, %v1184_v0, 0.0 }
 0x9e7   : > { %1186 = vadd.xlane.f32.xlu0 %v1185_v33 }
 0xa5a   : > { %v1187_v35 = vpop.xlane.xlu0 %1186 }
 0xa5b   : > { %v1188_v36 = vmul.f32 %v1187_v35, %v3006_v19 }
 0xa5d   : > { %v1189_v37 = vadd.f32 1e-05, %v1188_v36 }
 0xa5f   : > { %2567 = vrsqrt.f32 %v1189_v37  ;;  %vm1196_vm4 = vweird.f32 %v1189_v37 }
 0xa65   : > { %v2568_v38 = vpop.eup %2567 }
 0xa66   : > { %v1191_v39 = vmul.f32 %v2568_v38, %v1189_v37  ;;  %vm1197_vm3 = vweird.f32 %v2568_v38 }
 0xa67   : > { %vm1198_vm5 = vmor %vm1196_vm4, %vm1197_vm3 }
 0xa68   : > { %v1192_v17 = vmul.f32 %v2568_v38, %v1191_v39 }
 0xa6a   : > { %v1193_v40 = vmul.f32 0.5, %v1192_v17 }
 0xa6c   : > { %v1194_v41 = vsub.f32 1.5, %v1193_v40 }
 0xa6e   : > { %v1195_v42 = vmul.f32 %v2568_v38, %v1194_v41 }
 0xa70   : > { %v1199_v44 = vsel %vm1198_vm5, %v2568_v38, %v1195_v42 }
 0xa71   : > { %v1200_v6 = vmul.f32 %v1199_v44, %v1183_v32 }
 0xa73   : > { %v1202_v45 = vmul.f32 %v1201_v43, %v1200_v6 }
 0xa75   : > { %v3062_v46 = vadd.f32 %v1203_v5, %v1202_v45 }
 0xa76 LB: >> { %s3075_s21 = sshll.u32 %s2703_s19, 5  ;;  %s2405_s22 = sshll.u32 %s2703_s19, 4  ;;  %s2703_s19 = sphi %s3066_s19, %s1241_s19   ;;  %v2699_v34 = vphi %v1235_v34, %v3412_v34  }
 0xa77   : >> { %s1248_s27 = scalar_lea.vmem %s3363_s11, %s3075_s21  ;;  %s3087_s24 = scalar_lea.vmem %s3370_s18, %s2405_s22 }
 0xa78   : >> { %v1252_v47 = vld [vmem:[%s1248_s27 + $0x18] sm:$0xff]  ;;  %v1251_v48 = vld [vmem:[%s1248_s27 + $0x10] sm:$0xff]  ;;  %v1250_v49 = vld [vmem:[%s1248_s27 + $0x8] sm:$0xff]  ;;  %s2721_s20 = smov 72   ;;  %s2722_s2 = smov 120  }
 0xa79   : >> { %1269 = vmatpush.msra.mxu0 %v1252_v47  ;;  %v1249_v50 = vld [vmem:[%s1248_s27] sm:$0xff]  ;;  %s2723_s28 = smov 96   ;;  %s2724_s3 = smov 112  }
 0xa7a   : >> { %v3090_v51 = vld [vmem:[%s3087_s24] sm:$0xff]  ;;  %s3386_s30 = smov 80   ;;  %s3385_s26 = smov 88  }
 0xa7b   : >> { %1270 = vmatpush.msra.mxu0 %v1251_v48  ;;  %v1253_v52 = vperm.slane %v3090_v51, 0  ;;  %s2727_s27 = smov 104   ;;  %s2728_s22 = smov 56  }
 0xa7c   : >> { %s2729_s29 = smov 40   ;;  %s2730_s23 = smov 64  }
 0xa7d   : >> { %1271 = vmatpush.msra.mxu0 %v1250_v49 }
 0xa7f   : >> { %1272 = vmatpush.msra.mxu0 %v1249_v50 }
 0xa80   : >> { %2407 = vmatmul.msk.f32.vlgmr.msra.gmra.mxu0 %vm664_vm1, %v2699_v34 }
 0xafd   : >> { %v1274_v53 = vpop.f32.mrf.mxu0 }
 0xafe   : >> { %v3093_v54 = vadd.f32 %v1274_v53, %v1253_v52 }
 0xb00   : >> { %1518 = vrot.lane.b32.xlu2 %v3093_v54, %s2721_s20  ;;  %1360 = vrot.lane.b32.xlu1 %v3093_v54, %s2722_s2 }
 0xb01   : >> { %1283 = vrot.lane.b32.xlu0 %v3093_v54, %s2723_s28 }
 0xb08   : >> { %1438 = vrot.lane.b32.xlu2 %v3093_v54, %s2724_s3  ;;  %1440 = vrot.lane.b32.xlu1 %v3093_v54, %s3386_s30  ;;  %s1277_s30 = scalar_lea.vmem %s3364_s12, %s3075_s21 }
 0xb09   : >> { %1362 = vrot.lane.b32.xlu0 %v3093_v54, %s3385_s26  ;;  %s1690_s26 = scalar_lea.vmem %s3366_s14, %s3075_s21 }
 0xb11   : >> { %1516 = vrot.lane.b32.xlu0 %v3093_v54, %s2727_s27 }
 0xb5a   : >> { %v1519_v57 = vpop.permute.xlu2 %1518 }
 0xb62   : >> { %v1439_v60 = vpop.permute.xlu2 %1438 }
 0xb72   : >> { %v1361_v55 = vpop.permute.xlu1 %1360 }
 0xb73   : >> { %v1284_v56 = vpop.permute.xlu0 %1283 }
 0xb74   : >> { %2408 = vmatpush.xpose.msk.msra.mxu1 %vm696_vm2, %v1284_v56 }
 0xb77   : >> { %2409 = vmatmul.msk.f32.vlgmr.msra.gmra.mxu1 %vm696_vm2, %v3093_v54 }
 0xb7a   : >> { %v1441_v58 = vpop.permute.xlu1 %1440 }
 0xb7b   : >> { %v1363_v59 = vpop.permute.xlu0 %1362  ;;  %2414 = vmatpush.xpose.msk.msrb.mxu1 %vm696_vm2, %v1441_v58 }
 0xb7c   : >> { %2411 = vmatpush.xpose.msk.msrb.mxu0 %vm696_vm2, %v1363_v59 }
 0xb7f   : >> { %2412 = vmatmul.msk.f32.vlgmr.msrb.gmra.mxu0 %vm696_vm2, %v1361_v55  ;;  %2415 = vmatmul.msk.f32.vlgmr.msrb.gmra.mxu1 %vm696_vm2, %v1439_v60 }
 0xb80   : >> { %2417 = vmatpush.xpose.msk.msra.mxu0 %vm696_vm2, %v1519_v57 }
 0xb83   : >> { %v1517_v61 = vpop.permute.xlu0 %1516 }
 0xb87   : >> { %2418 = vmatmul.msk.f32.vlgmr.msra.gmra.mxu0 %vm696_vm2, %v1517_v61 }
 0xbf4   : >> { %v1307_v62 = vpop.f32.mrf.mxu1 }
 0xbf5   : >> { %v1308_v63 = vadd.f32 %v1307_v62, %v3052_v29 }
 0xbf7   : >> { %v1310_v3 = vsel %vm696_vm2, %v1308_v63, -inf }
 0xbf8   : >> { %1311 = vmax.xlane.f32.xlu1 %v1310_v3 }
 0xbfc   : >> { %v1385_v8 = vpop.f32.mrf.mxu0  ;;  %v1463_v10 = vpop.f32.mrf.mxu1 }
 0xbfd   : >> { %v1386_v11 = vadd.f32 %v1385_v8, %v3052_v29  ;;  %v1464_v12 = vadd.f32 %v1463_v10, %v3052_v29 }
 0xbff   : >> { %v1466_v7 = vsel %vm696_vm2, %v1464_v12, -inf  ;;  %v1388_v13 = vsel %vm696_vm2, %v1386_v11, -inf }
 0xc00   : >> { %1467 = vmax.xlane.f32.xlu0 %v1466_v7  ;;  %1389 = vmax.xlane.f32.xlu2 %v1388_v13 }
 0xc04   : >> { %v1541_v15 = vpop.f32.mrf.mxu0 }
 0xc05   : >> { %v1542_v16 = vadd.f32 %v1541_v15, %v3052_v29 }
 0xc07   : >> { %v1544_v18 = vsel %vm696_vm2, %v1542_v16, -inf }
 0xc08   : >> { %1545 = vmax.xlane.f32.xlu2 %v1544_v18 }
 0xc14   : >> { %1412 = vrot.lane.b32.xlu0 %v3093_v54, %s2728_s22  ;;  %s2731_s22 = smov 48  }
 0xc6b   : >> { %v1312_v20 = vpop.xlane.xlu1 %1311 }
 0xc6c   : >> { %v1313_v21 = vsub.f32 %v1308_v63, %v1312_v20 }
 0xc6e   : >> { %v1314_v22 = vmul.f32 1.442695, %v1313_v21 }
 0xc70   : >> { %2569 = vpow2.f32 %v1314_v22 }
 0xc73   : >> { %v1390_v9 = vpop.xlane.xlu2 %1389  ;;  %v1468_v23 = vpop.xlane.xlu0 %1467 }
 0xc74   : >> { %v1391_v24 = vsub.f32 %v1386_v11, %v1390_v9  ;;  %v1469_v14 = vsub.f32 %v1464_v12, %v1468_v23 }
 0xc76   : >> { %v2570_v25 = vpop.eup %2569  ;;  %v1392_v26 = vmul.f32 1.442695, %v1391_v24  ;;  %v1470_v27 = vmul.f32 1.442695, %v1469_v14 }
 0xc77   : >> { %v1316_v28 = vsel %vm696_vm2, %v2570_v25, 0.0 }
 0xc78   : >> { %2571 = vpow2.f32 %v1392_v26  ;;  %1317 = vadd.xlane.f32.xlu1 %v1316_v28 }
 0xc79   : >> { %2573 = vpow2.f32 %v1470_v27 }
 0xc7b   : >> { %v1546_v30 = vpop.xlane.xlu2 %1545 }
 0xc7c   : >> { %v1547_v31 = vsub.f32 %v1542_v16, %v1546_v30 }
 0xc7e   : >> { %v3128_v32 = vpop.eup %2571  ;;  %v1548_v0 = vmul.f32 1.442695, %v1547_v31 }
 0xc7f   : >> { %v3130_v33 = vpop.eup %2573  ;;  %v1394_v1 = vsel %vm696_vm2, %v3128_v32, 0.0 }
 0xc80   : >> { %2575 = vpow2.f32 %v1548_v0  ;;  %1395 = vadd.xlane.f32.xlu2 %v1394_v1  ;;  %v1472_v2 = vsel %vm696_vm2, %v3130_v33, 0.0 }
 0xc81   : >> { %1473 = vadd.xlane.f32.xlu0 %v1472_v2 }
 0xc86   : >> { %v3136_v35 = vpop.eup %2575  ;;  %v1413_v38 = vpop.permute.xlu0 %1412 }
 0xc87   : >> { %v1550_v36 = vsel %vm696_vm2, %v3136_v35, 0.0 }
 0xc88   : >> { %1551 = vadd.xlane.f32.xlu1 %v1550_v36  ;;  %v1280_v36 = vld [vmem:[%s1277_s30 + $0x10] sm:$0xff] }
 0xc95   : >> { %1568 = vrot.lane.b32.xlu0 %v3093_v54, %s2729_s29  ;;  %s2732_s29 = smov 8  }
 0xc98   : >> { %1334 = vrot.lane.b32.xlu2 %v3093_v54, %s2730_s23  ;;  %s3387_s23 = smov 24  }
 0xca1   : >> { %1490 = vrot.lane.b32.xlu1 %v3093_v54, %s2731_s22  ;;  %s2734_s22 = smov 16  }
 0xceb   : >> { %v1318_v37 = vpop.xlane.xlu1 %1317 }
 0xcec   : >> { %2577 = vrcp.f32 %v1318_v37  ;;  %v1330_v44 = vand.u32 2147483648, %v1318_v37  ;;  %v1328_v5 = vand.u32 2147483647, %v1318_v37  ;;  %vm1324_vm8 = vweird.f32 %v1318_v37 }
 0xcee   : >> { %v1331_v53 = vor.u32 1.1754944e-38, %v1330_v44  ;;  %vm1329_vm10 = vcmp.eq.f32.partialorder %v1328_v5, 8.507059e+37  ;;  %v1610_v44 = vperm.slane %v3090_v51, 1 }
 0xcf2   : >> { %v2578_v39 = vpop.eup %2577 }
 0xcf3   : >> { %v1320_v17 = vmul.f32 %v2578_v39, %v1318_v37  ;;  %v1396_v40 = vpop.xlane.xlu2 %1395  ;;  %vm1325_vm7 = vweird.f32 %v2578_v39  ;;  %v1279_v37 = vld [vmem:[%s1277_s30 + $0x8] sm:$0xff] }
 0xcf4   : >> { %2579 = vrcp.f32 %v1396_v40  ;;  %v3143_v41 = vpop.xlane.xlu0 %1473  ;;  %vm1326_vm9 = vmor %vm1324_vm8, %vm1325_vm7  ;;  %v1408_v57 = vand.u32 2147483648, %v1396_v40  ;;  %v1406_v60 = vand.u32 2147483647, %v1396_v40  ;;  %vm1402_vm13 = vweird.f32 %v1396_v40 }
 0xcf5   : >> { %v1321_v42 = vsub.f32 1.0, %v1320_v17  ;;  %2581 = vrcp.f32 %v3143_v41  ;;  %v1486_v23 = vand.u32 2147483648, %v3143_v41  ;;  %v1484_v14 = vand.u32 2147483647, %v3143_v41 }
 0xcf6   : >> { %v1409_v3 = vor.u32 1.1754944e-38, %v1408_v57  ;;  %vm1407_vm15 = vcmp.eq.f32.partialorder %v1406_v60, 8.507059e+37 }
 0xcf7   : >> { %v1322_v43 = vmul.f32 %v2578_v39, %v1321_v42  ;;  %v1487_v28 = vor.u32 1.1754944e-38, %v1486_v23 }
 0xcf9   : >> { %v1323_v6 = vadd.f32 %v2578_v39, %v1322_v43 }
 0xcfa   : >> { %v2580_v45 = vpop.eup %2579 }
 0xcfb   : >> { %v2582_v47 = vpop.eup %2581  ;;  %v1398_v48 = vmul.f32 %v2580_v45, %v1396_v40  ;;  %v1552_v49 = vpop.xlane.xlu1 %1551  ;;  %v1327_v52 = vsel %vm1326_vm9, %v2578_v39, %v1323_v6  ;;  %vm1403_vm12 = vweird.f32 %v2580_v45  ;;  %vm1480_vm9 = vweird.f32 %v3143_v41 }
 0xcfc   : >> { %v1335_v50 = vpop.permute.xlu2 %1334  ;;  %2583 = vrcp.f32 %v1552_v49  ;;  %v1476_v55 = vmul.f32 %v2582_v47, %v3143_v41  ;;  %v1332_v56 = vsel %vm1329_vm10, %v1331_v53, %v1327_v52  ;;  %vm1404_vm14 = vmor %vm1402_vm13, %vm1403_vm12  ;;  %v1564_v15 = vand.u32 2147483648, %v1552_v49  ;;  %v1691_v52 = vld [vmem:[%s1690_s26] sm:$0xff] }
 0xcfd   : >> { %1355 = vmatpush.msra.mxu2 %v1335_v50  ;;  %v1399_v54 = vsub.f32 1.0, %v1398_v48  ;;  %v1333_v58 = vmul.f32 %v2570_v25, %v1332_v56  ;;  %v1562_v18 = vand.u32 2147483647, %v1552_v49  ;;  %vm1558_vm4 = vweird.f32 %v1552_v49  ;;  %v1694_v48 = vld [vmem:[%s1690_s26 + $0x18] sm:$0xff]  ;;  %v1692_v50 = vld [vmem:[%s1690_s26 + $0x8] sm:$0xff] }
 0xcfe   : >> { %v1477_v61 = vsub.f32 1.0, %v1476_v55  ;;  %vm1481_vm5 = vweird.f32 %v2582_v47  ;;  %v1565_v9 = vor.u32 1.1754944e-38, %v1564_v15  ;;  %vm1485_vm12 = vcmp.eq.f32.partialorder %v1484_v14, 8.507059e+37  ;;  %1711 = vmatpush.msrb.mxu0 %v1694_v48 }
 0xcff   : >> { %1433 = vmatpush.msrb.mxu2 %v1413_v38  ;;  %v1400_v59 = vmul.f32 %v2580_v45, %v1399_v54  ;;  %vm1563_vm8 = vcmp.eq.f32.partialorder %v1562_v18, 8.507059e+37  ;;  %vm1482_vm10 = vmor %vm1480_vm9, %vm1481_vm5  ;;  %v1278_v38 = vld [vmem:[%s1277_s30] sm:$0xff]  ;;  %v3196_v18 = vld [vmem:[%s3087_s24 + $0x8] sm:$0x1f]  ;;  %s3409_s24 = smov 80  }
 0xd00   : >> { %2410 = vmatmul.msk.f32.vlgmr.msra.gmra.mxu2 %vm696_vm2, %v1333_v58  ;;  %v1478_v12 = vmul.f32 %v2582_v47, %v1477_v61  ;;  %v1695_v61 = vperm.slane %v3090_v51, 3 }
 0xd01   : >> { %v1401_v62 = vadd.f32 %v2580_v45, %v1400_v59 }
 0xd02   : >> { %v2584_v63 = vpop.eup %2583  ;;  %v1479_v22 = vadd.f32 %v2582_v47, %v1478_v12 }
 0xd03   : >> { %v1554_v8 = vmul.f32 %v2584_v63, %v1552_v49  ;;  %v1405_v10 = vsel %vm1404_vm14, %v2580_v45, %v1401_v62  ;;  %vm1559_vm3 = vweird.f32 %v2584_v63  ;;  %v1693_v49 = vld [vmem:[%s1690_s26 + $0x10] sm:$0xff]  ;;  %s2437_s26 = sshll.u32 %s2703_s19, 6  ;;  %s1241_s19 = sadd.s32 1, %s2703_s19  }
 0xd04   : >> { %v1410_v11 = vsel %vm1407_vm15, %v1409_v3, %v1405_v10  ;;  %vm1560_vm7 = vmor %vm1558_vm4, %vm1559_vm3  ;;  %v1483_v27 = vsel %vm1482_vm10, %v2582_v47, %v1479_v22  ;;  %1712 = vmatpush.msrb.mxu0 %v1693_v49  ;;  %p1238_p12 = scmp.ge.s32.totalorder %s1241_s19, 2  }
 0xd05   : >> { %v1555_v7 = vsub.f32 1.0, %v1554_v8  ;;  %v1411_v13 = vmul.f32 %v3128_v32, %v1410_v11  ;;  %v1488_v30 = vsel %vm1485_vm12, %v1487_v28, %v1483_v27  ;;  %s3413_s4 = sld [smem:[#allocation17_spill]] (%p1238_p12) }
 0xd06   : >> { %v1489_v32 = vmul.f32 %v3130_v33, %v1488_v30  ;;  %v1281_v33 = vld [vmem:[%s1277_s30 + $0x18] sm:$0xff]  ;;  %1713 = vmatpush.msrb.mxu0 %v1692_v50  ;;  %s3415_s30 = sld [smem:[#allocation18_spill]] (%p1238_p12) }
 0xd07   : >> { %v1556_v16 = vmul.f32 %v2584_v63, %v1555_v7  ;;  %v1569_v20 = vpop.permute.xlu0 %1568  ;;  %1626 = vmatpush.msra.mxu1 %v1281_v33 }
 0xd08   : >> { %2413 = vmatmul.msk.f32.vlgmr.msrb.gmra.mxu2 %vm696_vm2, %v1411_v13  ;;  %1714 = vmatpush.msrb.mxu0 %v1691_v52 }
 0xd09   : >> { %v1557_v21 = vadd.f32 %v2584_v63, %v1556_v16  ;;  %1589 = vmatpush.msra.mxu2 %v1569_v20  ;;  %1627 = vmatpush.msra.mxu1 %v1280_v36  ;;  %v1657_v20 = vperm.slane %v3090_v51, 7 }
 0xd0a   : >> { %2422 = vmatmul.msk.f32.vlgmr.msrb.gmra.mxu0 %vm664_vm1, %v3062_v46 }
 0xd0b   : >> { %v1561_v24 = vsel %vm1560_vm7, %v2584_v63, %v1557_v21  ;;  %1628 = vmatpush.msra.mxu1 %v1279_v37  ;;  %v2219_v29 = vld [vmem:[%s3413_s4 + $0x8] sm:$0xff] (%p1238_p12)  ;;  %v2218_v46 = vld [vmem:[%s3413_s4] sm:$0xff] (%p1238_p12) }
 0xd0c   : >> { %v1566_v25 = vsel %vm1563_vm8, %v1565_v9, %v1561_v24  ;;  %v1659_v9 = vperm.slane %v3196_v18, 0 }
 0xd0d   : >> { %v1567_v26 = vmul.f32 %v3136_v35, %v1566_v25  ;;  %1629 = vmatpush.msra.mxu1 %v1278_v38 }
 0xd10   : >> { %2419 = vmatmul.msk.f32.vlgmr.msra.gmra.mxu2 %vm696_vm2, %v1567_v26  ;;  %v1666_v26 = vperm.slane %v3090_v51, 2 }
 0xd13   : >> { %v1491_v31 = vpop.permute.xlu1 %1490 }
 0xd14   : >> { %1511 = vmatpush.msra.mxu3 %v1491_v31 }
 0xd15   : >> { %2416 = vmatmul.msk.f32.vlgmr.msra.gmra.mxu3 %vm696_vm2, %v1489_v32 }
 0xd83   : >> { %v1357_v0 = vpop.f32.mrf.mxu2 }
 0xd87   : >> { %v1716_v62 = vpop.f32.mrf.mxu0 }
 0xd88   : >> { %v3184_v63 = vadd.f32 %v1716_v62, %v1695_v61 }
 0xd8a   : >> { %2423 = vmatpush.xpose.msk.msrb.mxu2 %vm696_vm2, %v3184_v63 }
 0xd8b   : >> { %v1435_v1 = vpop.f32.mrf.mxu2 }
 0xd8c   : >> { %1595 = vrot.lane.b32.xlu2 %v1435_v1, %s2732_s29 }
 0xd93   : >> { %v1591_v2 = vpop.f32.mrf.mxu2 }
 0xd94   : >> { %1603 = vrot.lane.b32.xlu0 %v1591_v2, %s3387_s23  ;;  %s1661_s23 = scalar_lea.vmem %s3365_s13, %s3075_s21 }
 0xd95   : >> { %v1665_v57 = vld [vmem:[%s1661_s23 + $0x18] sm:$0xff]  ;;  %v1664_v58 = vld [vmem:[%s1661_s23 + $0x10] sm:$0xff]  ;;  %v1663_v59 = vld [vmem:[%s1661_s23 + $0x8] sm:$0xff] }
 0xd96   : >> { %1682 = vmatpush.msrb.mxu3 %v1665_v57  ;;  %v1662_v60 = vld [vmem:[%s1661_s23] sm:$0xff]  ;;  %s3414_s23 = sld [smem:[#allocation6_spill]] (%p1238_p12) }
 0xd98   : >> { %v1513_v35 = vpop.f32.mrf.mxu3  ;;  %1683 = vmatpush.msrb.mxu3 %v1664_v58 }
 0xd99   : >> { %1599 = vrot.lane.b32.xlu1 %v1513_v35, %s2734_s22 }
 0xd9a   : >> { %1684 = vmatpush.msrb.mxu3 %v1663_v59 }
 0xd9c   : >> { %1685 = vmatpush.msrb.mxu3 %v1662_v60  ;;  %1802 = vrot.lane.b32.xlu0 %v3184_v63, %s2722_s2 }
 0xda4   : >> { %1880 = vrot.lane.b32.xlu0 %v3184_v63, %s2724_s3 }
 0xdac   : >> { %1958 = vrot.lane.b32.xlu0 %v3184_v63, %s2727_s27 }
 0xde6   : >> { %v1596_v39 = vpop.permute.xlu2 %1595 }
 0xde7   : >> { %v1606_v17 = vsel %vm696_vm2, %v1357_v0, %v1596_v39 }
 0xe06   : >> { %v1604_v41 = vpop.permute.xlu0 %1603 }
 0xe0b   : >> { %v1600_v40 = vpop.permute.xlu1 %1599 }
 0xe0c   : >> { %v1608_v42 = vsel %vm1018_vm6, %v1606_v17, %v1600_v40 }
 0xe0d   : >> { %v1609_v43 = vsel %vm622_vm0, %v1608_v42, %v1604_v41 }
 0xe0e   : >> { %2420 = vmatmul.msk.f32.vlgmr.msra.gmra.mxu1 %vm664_vm1, %v1609_v43  ;;  %v1803_v14 = vpop.permute.xlu0 %1802 }
 0xe0f   : >> { %2426 = vmatpush.xpose.msk.msra.mxu3 %vm696_vm2, %v1803_v14 }
 0xe16   : >> { %v1881_v25 = vpop.permute.xlu0 %1880 }
 0xe17   : >> { %2429 = vmatpush.xpose.msk.msra.mxu2 %vm696_vm2, %v1881_v25 }
 0xe1e   : >> { %v1959_v30 = vpop.permute.xlu0 %1958 }
 0xe8b   : >> { %v1631_v5 = vpop.f32.mrf.mxu1 }
 0xe8c   : >> { %v1632_v6 = vadd.f32 %v1631_v5, %v1610_v44 }
 0xe8e   : >> { %v1634_v45 = vadd.f32 %v2699_v34, %v1632_v6 }
 0xe90   : >> { %v1635_v47 = vsel %vm664_vm1, %v1634_v45, 0.0 }
 0xe91   : >> { %1636 = vadd.xlane.f32.xlu2 %v1635_v47 }
 0xf04   : >> { %v1637_v34 = vpop.xlane.xlu2 %1636 }
 0xf05   : >> { %v1638_v53 = vmul.f32 %v1637_v34, %v3006_v19 }
 0xf07   : >> { %v1639_v54 = vsub.f32 %v1634_v45, %v1638_v53 }
 0xf09   : >> { %v1640_v55 = vmul.f32 %v1639_v54, %v1639_v54 }
 0xf0b   : >> { %v1641_v56 = vsel %vm664_vm1, %v1640_v55, 0.0 }
 0xf0c   : >> { %1642 = vadd.xlane.f32.xlu1 %v1641_v56 }
 0xf7f   : >> { %v1643_v3 = vpop.xlane.xlu1 %1642 }
 0xf80   : >> { %v1644_v8 = vmul.f32 %v1643_v3, %v3006_v19 }
 0xf82   : >> { %v1645_v10 = vadd.f32 1e-05, %v1644_v8 }
 0xf84   : >> { %2585 = vrsqrt.f32 %v1645_v10  ;;  %vm1652_vm14 = vweird.f32 %v1645_v10 }
 0xf8a   : >> { %v2586_v11 = vpop.eup %2585 }
 0xf8b   : >> { %v1647_v12 = vmul.f32 %v2586_v11, %v1645_v10  ;;  %vm1653_vm13 = vweird.f32 %v2586_v11 }
 0xf8c   : >> { %vm1654_vm15 = vmor %vm1652_vm14, %vm1653_vm13 }
 0xf8d   : >> { %v1648_v7 = vmul.f32 %v2586_v11, %v1647_v12 }
 0xf8f   : >> { %v1649_v13 = vmul.f32 0.5, %v1648_v7 }
 0xf91   : >> { %v1650_v15 = vsub.f32 1.5, %v1649_v13 }
 0xf93   : >> { %v1651_v16 = vmul.f32 %v2586_v11, %v1650_v15 }
 0xf95   : >> { %v1655_v21 = vsel %vm1654_vm15, %v2586_v11, %v1651_v16 }
 0xf96   : >> { %v1656_v22 = vmul.f32 %v1655_v21, %v1639_v54 }
 0xf98   : >> { %v1658_v23 = vmul.f32 %v1657_v20, %v1656_v22 }
 0xf9a   : >> { %v3200_v24 = vadd.f32 %v1659_v9, %v1658_v23 }
 0xf9c   : >> { %2421 = vmatmul.msk.f32.vlgmr.msrb.gmra.mxu3 %vm664_vm1, %v3200_v24 }
 0xf9d   : >> { %2432 = vmatpush.xpose.msk.msrb.mxu3 %vm696_vm2, %v1959_v30 }
0x101f   : >> { %v1687_v27 = vpop.f32.mrf.mxu3 }
0x1020   : >> { %v1688_v28 = vadd.f32 %v1687_v27, %v1666_v26 }
0x1022   : >> { %1956 = vrot.lane.b32.xlu2 %v1688_v28, %s2727_s27  ;;  %1800 = vrot.lane.b32.xlu0 %v1688_v28, %s2722_s2  ;;  %s3411_s2 = smov 24   ;;  %s1719_s27 = scalar_lea.vmem %s3367_s15, %s3075_s21 }
0x1023   : >> { %2424 = vmatmul.msk.f32.vlgmr.msrb.gmra.mxu2 %vm696_vm2, %v1688_v28 }
0x102a   : >> { %1878 = vrot.lane.b32.xlu0 %v1688_v28, %s2724_s3 }
0x107c   : >> { %v1957_v32 = vpop.permute.xlu2 %1956 }
0x1094   : >> { %v1801_v31 = vpop.permute.xlu0 %1800 }
0x1095   : >> { %2427 = vmatmul.msk.f32.vlgmr.msra.gmra.mxu3 %vm696_vm2, %v1801_v31 }
0x109c   : >> { %v1879_v0 = vpop.permute.xlu0 %1878 }
0x109d   : >> { %2430 = vmatmul.msk.f32.vlgmr.msra.gmra.mxu2 %vm696_vm2, %v1879_v0  ;;  %2433 = vmatmul.msk.f32.vlgmr.msrb.gmra.mxu3 %vm696_vm2, %v1957_v32 }
0x10a6   : >> { %v1747_v1 = vpop.f32.mrf.mxu2 }
0x10a7   : >> { %v1750_v2 = vsel %vm696_vm2, %v1747_v1, -inf }
0x10a8   : >> { %1751 = vmax.xlane.f32.xlu1 %v1750_v2 }
0x1118   : >> { %v1825_v35 = vpop.f32.mrf.mxu3 }
0x1119   : >> { %v1828_v33 = vsel %vm696_vm2, %v1825_v35, -inf }
0x111a   : >> { %1829 = vmax.xlane.f32.xlu0 %v1828_v33 }
0x111b   : >> { %v1752_v36 = vpop.xlane.xlu1 %1751 }
0x111c   : >> { %v1753_v37 = vsub.f32 %v1747_v1, %v1752_v36 }
0x111e   : >> { %v1754_v38 = vmul.f32 1.442695, %v1753_v37 }
0x1120   : >> { %2587 = vpow2.f32 %v1754_v38  ;;  %v1903_v39 = vpop.f32.mrf.mxu2  ;;  %v1981_v41 = vpop.f32.mrf.mxu3 }
0x1121   : >> { %v1906_v17 = vsel %vm696_vm2, %v1903_v39, -inf  ;;  %v1984_v43 = vsel %vm696_vm2, %v1981_v41, -inf }
0x1122   : >> { %1907 = vmax.xlane.f32.xlu1 %v1906_v17 }
0x1126   : >> { %v2588_v40 = vpop.eup %2587 }
0x1127   : >> { %v1756_v42 = vsel %vm696_vm2, %v2588_v40, 0.0 }
0x1128   : >> { %1757 = vadd.xlane.f32.xlu2 %v1756_v42 }
0x112a   : >> { %1985 = vmax.xlane.f32.xlu1 %v1984_v43 }
0x112e   : >> { %1774 = vrot.lane.b32.xlu0 %v3184_v63, %s2723_s28 }
0x1136   : >> { %2008 = vrot.lane.b32.xlu0 %v3184_v63, %s2721_s20  ;;  %s3410_s20 = smov 88  }
0x1140   : >> { %1930 = vrot.lane.b32.xlu2 %v3184_v63, %s3409_s24  ;;  %s3267_s24 = scalar_lea.vmem %s3369_s17, %s2437_s26 }
0x118d   : >> { %v1830_v44 = vpop.xlane.xlu0 %1829 }
0x118e   : >> { %v1831_v5 = vsub.f32 %v1825_v35, %v1830_v44 }
0x1190   : >> { %v1832_v6 = vmul.f32 1.442695, %v1831_v5 }
0x1192   : >> { %2589 = vpow2.f32 %v1832_v6 }
0x1195   : >> { %v1908_v45 = vpop.xlane.xlu1 %1907 }
0x1196   : >> { %v1909_v47 = vsub.f32 %v1903_v39, %v1908_v45 }
0x1198   : >> { %v3226_v48 = vpop.eup %2589  ;;  %v1910_v49 = vmul.f32 1.442695, %v1909_v47 }
0x1199   : >> { %v1834_v50 = vsel %vm696_vm2, %v3226_v48, 0.0 }
0x119a   : >> { %2591 = vpow2.f32 %v1910_v49  ;;  %1835 = vadd.xlane.f32.xlu1 %v1834_v50 }
0x119b   : >> { %v1758_v52 = vpop.xlane.xlu2 %1757 }
0x119c   : >> { %2593 = vrcp.f32 %v1758_v52  ;;  %v1770_v62 = vand.u32 2147483648, %v1758_v52  ;;  %v1768_v8 = vand.u32 2147483647, %v1758_v52  ;;  %vm1764_vm4 = vweird.f32 %v1758_v52 }
0x119d   : >> { %v1986_v34 = vpop.xlane.xlu1 %1985 }
0x119e   : >> { %v1987_v53 = vsub.f32 %v1981_v41, %v1986_v34  ;;  %v1771_v7 = vor.u32 1.1754944e-38, %v1770_v62  ;;  %vm1769_vm7 = vcmp.eq.f32.partialorder %v1768_v8, 8.507059e+37 }
0x11a0   : >> { %v2592_v54 = vpop.eup %2591  ;;  %v1988_v55 = vmul.f32 1.442695, %v1987_v53  ;;  %v1775_v56 = vpop.permute.xlu0 %1774 }
0x11a1   : >> { %1795 = vmatpush.msrb.mxu1 %v1775_v56  ;;  %v1912_v57 = vsel %vm696_vm2, %v2592_v54, 0.0 }
0x11a2   : >> { %v2594_v58 = vpop.eup %2593  ;;  %2595 = vpow2.f32 %v1988_v55  ;;  %1913 = vadd.xlane.f32.xlu1 %v1912_v57  ;;  %v1723_v57 = vld [vmem:[%s1719_s27 + $0x18] sm:$0xff] }
0x11a3   : >> { %v1760_v59 = vmul.f32 %v2594_v58, %v1758_v52  ;;  %v1931_v60 = vpop.permute.xlu2 %1930  ;;  %vm1765_vm3 = vweird.f32 %v2594_v58  ;;  %2065 = vmatpush.msrb.mxu2 %v1723_v57 }
0x11a4   : >> { %1951 = vmatpush.msra.mxu1 %v1931_v60  ;;  %vm1766_vm5 = vmor %vm1764_vm4, %vm1765_vm3  ;;  %v1720_v60 = vld [vmem:[%s1719_s27] sm:$0xff] }
0x11a5   : >> { %v1761_v61 = vsub.f32 1.0, %v1760_v59  ;;  %v1721_v59 = vld [vmem:[%s1719_s27 + $0x8] sm:$0xff] }
0x11a7   : >> { %v1762_v3 = vmul.f32 %v2594_v58, %v1761_v61 }
0x11a8   : >> { %v3231_v10 = vpop.eup %2595  ;;  %v2009_v49 = vpop.permute.xlu0 %2008 }
0x11a9   : >> { %v1763_v11 = vadd.f32 %v2594_v58, %v1762_v3  ;;  %v1990_v12 = vsel %vm696_vm2, %v3231_v10, 0.0 }
0x11aa   : >> { %1991 = vadd.xlane.f32.xlu1 %v1990_v12  ;;  %v2049_v12 = vperm.slane %v3090_v51, 4 }
0x11ab   : >> { %v1767_v13 = vsel %vm1766_vm5, %v2594_v58, %v1763_v11  ;;  %v1722_v58 = vld [vmem:[%s1719_s27 + $0x10] sm:$0xff]  ;;  %s3420_s27 = sand.u32 (%p1238_p12), 1, %s3414_s23  }
0x11ac   : >> { %v1772_v15 = vsel %vm1769_vm7, %v1771_v7, %v1767_v13  ;;  %2066 = vmatpush.msrb.mxu2 %v1722_v58 }
0x11ad   : >> { %v1773_v16 = vmul.f32 %v2588_v40, %v1772_v15 }
0x11ae   : >> { %2067 = vmatpush.msrb.mxu2 %v1721_v59 }
0x11af   : >> { %2425 = vmatmul.msk.f32.vlgmr.msrb.gmra.mxu1 %vm696_vm2, %v1773_v16 }
0x11b0   : >> { %2068 = vmatpush.msrb.mxu2 %v1720_v60 }
0x11c3   : >> { %1852 = vrot.lane.b32.xlu1 %v3184_v63, %s3410_s20 }
0x120d   : >> { %v1836_v20 = vpop.xlane.xlu1 %1835 }
0x120e   : >> { %2597 = vrcp.f32 %v1836_v20  ;;  %v1848_v39 = vand.u32 2147483648, %v1836_v20  ;;  %vm1842_vm14 = vweird.f32 %v1836_v20  ;;  %v1846_v17 = vand.u32 2147483647, %v1836_v20 }
0x1210   : >> { %v1849_v42 = vor.u32 1.1754944e-38, %v1848_v39  ;;  %vm1847_vm3 = vcmp.eq.f32.partialorder %v1846_v17, 8.507059e+37  ;;  %v2096_v39 = vperm.slane %v3196_v18, 1 }
0x1214   : >> { %v2598_v22 = vpop.eup %2597 }
0x1215   : >> { %v1914_v21 = vpop.xlane.xlu1 %1913  ;;  %v1838_v25 = vmul.f32 %v2598_v22, %v1836_v20  ;;  %vm1843_vm13 = vweird.f32 %v2598_v22 }
0x1216   : >> { %2599 = vrcp.f32 %v1914_v21  ;;  %v1926_v27 = vand.u32 2147483648, %v1914_v21  ;;  %v1924_v30 = vand.u32 2147483647, %v1914_v21  ;;  %vm1920_vm9 = vweird.f32 %v1914_v21  ;;  %vm1844_vm15 = vmor %vm1842_vm14, %vm1843_vm13 }
0x1217   : >> { %v1839_v31 = vsub.f32 1.0, %v1838_v25 }
0x1218   : >> { %v1927_v63 = vor.u32 1.1754944e-38, %v1926_v27  ;;  %vm1925_vm12 = vcmp.eq.f32.partialorder %v1924_v30, 8.507059e+37  ;;  %v2139_v27 = vld [vmem:[%s3267_s24 + $0x38] sm:$0xff]  ;;  %v2137_v30 = vld [vmem:[%s3267_s24 + $0x28] sm:$0xff] }
0x1219   : >> { %v1840_v35 = vmul.f32 %v2598_v22, %v1839_v31  ;;  %2153 = vmatpush.msra.mxu3 %v2139_v27 }
0x121b   : >> { %v1841_v37 = vadd.f32 %v2598_v22, %v1840_v35 }
0x121c   : >> { %v2600_v9 = vpop.eup %2599 }
0x121d   : >> { %v1916_v23 = vmul.f32 %v2600_v9, %v1914_v21  ;;  %v1992_v14 = vpop.xlane.xlu1 %1991  ;;  %vm1921_vm8 = vweird.f32 %v2600_v9  ;;  %v1845_v41 = vsel %vm1844_vm15, %v2598_v22, %v1841_v37 }
0x121e   : >> { %2601 = vrcp.f32 %v1992_v14  ;;  %vm1922_vm10 = vmor %vm1920_vm9, %vm1921_vm8  ;;  %v1850_v43 = vsel %vm1847_vm3, %v1849_v42, %v1845_v41  ;;  %v2004_v5 = vand.u32 2147483648, %v1992_v14  ;;  %vm1998_vm5 = vweird.f32 %v1992_v14 }
0x121f   : >> { %v1917_v26 = vsub.f32 1.0, %v1916_v23  ;;  %v2002_v6 = vand.u32 2147483647, %v1992_v14  ;;  %v1851_v47 = vmul.f32 %v3226_v48, %v1850_v43  ;;  %v2098_v41 = vperm.slane %v3196_v18, 2 }
0x1220   : >> { %v2005_v52 = vor.u32 1.1754944e-38, %v2004_v5  ;;  %v2133_v5 = vld [vmem:[%s3267_s24 + $0x8] sm:$0xff] }
0x1221   : >> { %v1918_v28 = vmul.f32 %v2600_v9, %v1917_v26  ;;  %vm2003_vm8 = vcmp.eq.f32.partialorder %v2002_v6, 8.507059e+37  ;;  %v2132_v6 = vld [vmem:[%s3267_s24] sm:$0xff] }
0x1223   : >> { %v1919_v32 = vadd.f32 %v2600_v9, %v1918_v28  ;;  %v2138_v28 = vld [vmem:[%s3267_s24 + $0x30] sm:$0xff] }
0x1224   : >> { %v2602_v0 = vpop.eup %2601  ;;  %2154 = vmatpush.msra.mxu3 %v2138_v28 }
0x1225   : >> { %v1923_v1 = vsel %vm1922_vm10, %v2600_v9, %v1919_v32  ;;  %v1994_v33 = vmul.f32 %v2602_v0, %v1992_v14  ;;  %vm1999_vm4 = vweird.f32 %v2602_v0 }
0x1226   : >> { %v1928_v2 = vsel %vm1925_vm12, %v1927_v63, %v1923_v1  ;;  %vm2000_vm7 = vmor %vm1998_vm5, %vm1999_vm4  ;;  %2155 = vmatpush.msra.mxu3 %v2137_v30  ;;  %v2135_v1 = vld [vmem:[%s3267_s24 + $0x18] sm:$0xff] }
0x1227   : >> { %v1929_v36 = vmul.f32 %v2592_v54, %v1928_v2  ;;  %v1995_v38 = vsub.f32 1.0, %v1994_v33 }
0x1229   : >> { %2431 = vmatmul.msk.f32.vlgmr.msra.gmra.mxu1 %vm696_vm2, %v1929_v36  ;;  %v1996_v40 = vmul.f32 %v2602_v0, %v1995_v38 }
0x122b   : >> { %v1997_v44 = vadd.f32 %v2602_v0, %v1996_v40 }
0x122c   : >> { %v1797_v54 = vpop.f32.mrf.mxu1 }
0x122d   : >> { %v2001_v50 = vsel %vm2000_vm7, %v2602_v0, %v1997_v44  ;;  %v2136_v0 = vld [vmem:[%s3267_s24 + $0x20] sm:$0xff]  ;;  %v2134_v44 = vld [vmem:[%s3267_s24 + $0x10] sm:$0xff]  ;;  %s3416_s24 = smov (%p1238_p12), %s3415_s30 }
0x122e   : >> { %v2006_v34 = vsel %vm2003_vm8, %v2005_v52, %v2001_v50  ;;  %2156 = vmatpush.msra.mxu3 %v2136_v0  ;;  %v2140_v52 = vperm.slane %v3090_v51, 6  ;;  %s2629_s0 = scalar_lea.hbm (%p1238_p12), %s3416_s24, 16 }
0x122f   : >> { %v2007_v53 = vmul.f32 %v3231_v10, %v2006_v34 }
0x1230   : >> { %2157 = vmatpush.msra.mxu3 %v2135_v1 }
0x1232   : >> { %2158 = vmatpush.msra.mxu3 %v2134_v44 }
0x1234   : >> { %2159 = vmatpush.msra.mxu3 %v2133_v5 }
0x1235   : >> { %v1853_v45 = vpop.permute.xlu1 %1852 }
0x1236   : >> { %1873 = vmatpush.msra.mxu0 %v1853_v45  ;;  %2160 = vmatpush.msra.mxu3 %v2132_v6  ;;  %v2105_v45 = vperm.slane %v3090_v51, 5 }
0x1237   : >> { %2428 = vmatmul.msk.f32.vlgmr.msra.gmra.mxu0 %vm696_vm2, %v1851_v47 }
0x1238   : >> { %2029 = vmatpush.msrb.mxu0 %v2009_v49 }
0x123f   : >> { %2434 = vmatmul.msk.f32.vlgmr.msrb.gmra.mxu0 %vm696_vm2, %v2007_v53 }
0x12a6   : >> { %v1953_v55 = vpop.f32.mrf.mxu1 }
0x12a7   : >> { %2039 = vrot.lane.b32.xlu1 %v1953_v55, %s2734_s22  ;;  %s2100_s22 = scalar_lea.vmem %s3368_s16, %s3075_s21 }
0x12a8   : >> { %v2104_v14 = vld [vmem:[%s2100_s22 + $0x18] sm:$0xff]  ;;  %v2103_v25 = vld [vmem:[%s2100_s22 + $0x10] sm:$0xff]  ;;  %v2101_v26 = vld [vmem:[%s2100_s22] sm:$0xff] }
0x12a9   : >> { %2121 = vmatpush.msrb.mxu1 %v2104_v14 }
0x12ab   : >> { %2122 = vmatpush.msrb.mxu1 %v2103_v25 }
0x12b4   : >> { %v1875_v48 = vpop.f32.mrf.mxu0 }
0x12b5   : >> { %2035 = vrot.lane.b32.xlu0 %v1875_v48, %s2732_s29  ;;  %s2249_s29 = scalar_lea.sflag (%p1238_p12), [#allocation3], %s3420_s27 }
0x12bc   : >> { %v2031_v56 = vpop.f32.mrf.mxu0 }
0x12bd   : >> { %2043 = vrot.lane.b32.xlu0 %v2031_v56, %s3411_s2  ;;  %s3418_s2 = scalar_lea.vmem (%p1238_p12), [#allocation2], %s2897_s25 }
0x12be   : > { %s2261_s28 = sshll.u32 (%p1238_p12), %s3418_s2, 4  ;;  %s3419_s3 = smov (%p1238_p12), %s3418_s2  ;;  %s2262_s28 = int_to_ptr.vmem [resolvable:$true] %s2261_s28 }
0x1319   : >> { %v2040_v3 = vpop.permute.xlu1 %2039 }
0x1327   : >> { %v2036_v61 = vpop.permute.xlu0 %2035 }
0x1328   : >> { %v2046_v62 = vsel %vm696_vm2, %v1797_v54, %v2036_v61 }
0x1329   : >> { %v2047_v8 = vsel %vm1018_vm6, %v2046_v62, %v2040_v3 }
0x132f   : >> { %v2044_v10 = vpop.permute.xlu0 %2043 }
0x1330   : >> { %v2048_v11 = vsel %vm622_vm0, %v2047_v8, %v2044_v10 }
0x1331   : >> { %2435 = vmatmul.msk.f32.vlgmr.msrb.gmra.mxu2 %vm664_vm1, %v2048_v11 }
0x13b4   : >> { %v2070_v7 = vpop.f32.mrf.mxu2 }
0x13b5   : >> { %v2071_v13 = vadd.f32 %v2070_v7, %v2049_v12  ;;  %v2188_v7 = vperm.slane %v3196_v18, 3 }
0x13b7   : >> { %v2073_v15 = vadd.f32 %v2071_v13, %v3200_v24  ;;  %v2102_v24 = vld [vmem:[%s2100_s22 + $0x8] sm:$0xff]  ;;  %s2441_s22 = sshll.u32 (%p1238_p12), %s2856_s1, 3 }
0x13b8   : >> { %2123 = vmatpush.msrb.mxu1 %v2102_v24  ;;  %v2221_v24 = vld [vmem:[%s3413_s4 + $0x18] sm:$0xff] (%p1238_p12)  ;;  %s2259_s20 = scalar_lea.hbm (%p1238_p12), %s3415_s30, %s2441_s22 }
0x13b9   : >> { %v2074_v16 = vsel %vm664_vm1, %v2073_v15, 0.0  ;;  %2238 = vmatpush.msra.mxu0 (%p1238_p12), %v2221_v24  ;;  %s2263_s19 = sshll.u32 (%p1238_p12), %s2259_s20, 4  ;;  %s2264_s19 = int_to_ptr.hbm [resolvable:$true] %s2263_s19 }
0x13ba   : >> { %2075 = vadd.xlane.f32.xlu1 %v2074_v16  ;;  %2124 = vmatpush.msrb.mxu1 %v2101_v26  ;;  %v2220_v26 = vld [vmem:[%s3413_s4 + $0x10] sm:$0xff] (%p1238_p12)  ;;  %s2623_s1 = sshra.s32 (%p1238_p12), %s2264_s19, 4  ;;  %s2624_s1 = int_to_ptr.hbm [resolvable:$true] %s2623_s1 }
0x13bb   : > { %2239 = vmatpush.msra.mxu0 (%p1238_p12), %v2220_v26  ;;  %s2625_s4 = scalar_lea.hbm (%p1238_p12), %s2624_s1, 8  ;;  %p2630_p2 = scmp.lt.s32.totalorder (%p1238_p12), %s2624_s1, %s3416_s24 }
0x13bc   : > { %p2626_p13 = scmp.ne.s32.totalorder (%p1238_p12), %s2624_s1, %s2625_s4  ;;  %p2631_p3 = scmp.lt.s32.totalorder (%p1238_p12), %s2629_s0, %s2625_s4 }
0x13bd   : > { %2240 = vmatpush.msra.mxu0 (%p1238_p12), %v2219_v29 }
0x13be   : > { %p2627_p0 = pnand (%p1238_p12), %p2626_p13, %p2873_p5  ;;  %p2632_p4 = por (%p1238_p12), %p2631_p3, %p2630_p2 }
0x13bf   : > { %2241 = vmatpush.msra.mxu0 (%p1238_p12), %v2218_v46 }
0x13c0   : > { %p2628_p1 = pneg (%p1238_p12), %p2627_p0 }
0x13c2   : > { %p2633_p7 = pnand (%p1238_p12), %p2632_p4, %p2628_p1 }
0x142d   : >> { %v2076_v20 = vpop.xlane.xlu1 %2075 }
0x142e   : >> { %v2077_v21 = vmul.f32 %v2076_v20, %v3006_v19 }
0x1430   : >> { %v2078_v22 = vsub.f32 %v2073_v15, %v2077_v21  ;;  %v2190_v15 = vperm.slane %v3196_v18, 4 }
0x1432   : >> { %v2079_v9 = vmul.f32 %v2078_v22, %v2078_v22 }
0x1434   : >> { %v2080_v23 = vsel %vm664_vm1, %v2079_v9, 0.0 }
0x1435   : >> { %2081 = vadd.xlane.f32.xlu2 %v2080_v23 }
0x14a8   : >> { %v2082_v31 = vpop.xlane.xlu2 %2081 }
0x14a9   : >> { %v2083_v32 = vmul.f32 %v2082_v31, %v3006_v19 }
0x14ab   : >> { %v2084_v63 = vadd.f32 1e-05, %v2083_v32 }
0x14ad   : >> { %2603 = vrsqrt.f32 %v2084_v63  ;;  %vm2091_vm10 = vweird.f32 %v2084_v63 }
0x14b3   : >> { %v2604_v2 = vpop.eup %2603 }
0x14b4   : >> { %v2086_v35 = vmul.f32 %v2604_v2, %v2084_v63  ;;  %vm2092_vm9 = vweird.f32 %v2604_v2 }
0x14b5   : >> { %vm2093_vm12 = vmor %vm2091_vm10, %vm2092_vm9 }
0x14b6   : >> { %v2087_v33 = vmul.f32 %v2604_v2, %v2086_v35  ;;  %v2214_v35 = vperm.slane (%p1238_p12), %v2920_v4, 4 }
0x14b8   : >> { %v2088_v36 = vmul.f32 0.5, %v2087_v33 }
0x14ba   : >> { %v2089_v37 = vsub.f32 1.5, %v2088_v36 }
0x14bc   : >> { %v2090_v38 = vmul.f32 %v2604_v2, %v2089_v37 }
0x14be   : >> { %v2094_v17 = vsel %vm2093_vm12, %v2604_v2, %v2090_v38 }
0x14bf   : >> { %v2095_v40 = vmul.f32 %v2094_v17, %v2078_v22 }
0x14c1   : >> { %v2097_v42 = vmul.f32 %v2096_v39, %v2095_v40  ;;  %v2222_v39 = vperm.slane (%p1238_p12), %v2920_v4, 1 }
0x14c3   : >> { %v2099_v43 = vadd.f32 %v2098_v41, %v2097_v42 }
0x14c5   : >> { %2436 = vmatmul.msk.f32.vlgmr.msrb.gmra.mxu1 %vm664_vm1, %v2099_v43 }
0x1542   : >> { %v2126_v47 = vpop.f32.mrf.mxu1 }
0x1543   : >> { %v2127_v49 = vadd.f32 %v2126_v47, %v2105_v45 }
0x1545   : >> { %v2129_v50 = vmax.f32 %v2127_v49, 0.0 }
0x1547   : >> { %2438 = vmatmul.msk.f32.vlgmr.msra.gmra.mxu3 %vm1120_vm11, %v2129_v50  ;;  %vm2246_vm11 = vcmask (%p1238_p12), 392192  }
0x15ca   : >> { %v2162_v34 = vpop.f32.mrf.mxu3 }
0x15cb   : >> { %v2163_v53 = vadd.f32 %v2162_v34, %v2140_v52 }
0x15cd   : >> { %v2165_v54 = vadd.f32 %v2163_v53, %v2099_v43 }
0x15cf   : >> { %v2166_v55 = vsel %vm664_vm1, %v2165_v54, 0.0 }
0x15d0   : >> { %2167 = vadd.xlane.f32.xlu0 %v2166_v55 }
0x1643   : >> { %v2168_v48 = vpop.xlane.xlu0 %2167 }
0x1644   : >> { %v2169_v56 = vmul.f32 %v2168_v48, %v3006_v19 }
0x1646   : >> { %v2170_v57 = vsub.f32 %v2165_v54, %v2169_v56 }
0x1648   : >> { %v2171_v58 = vmul.f32 %v2170_v57, %v2170_v57 }
0x164a   : >> { %v2172_v59 = vsel %vm664_vm1, %v2171_v58, 0.0 }
0x164b   : >> { %2173 = vadd.xlane.f32.xlu1 %v2172_v59 }
0x16be   : >> { %v2174_v60 = vpop.xlane.xlu1 %2173 }
0x16bf   : >> { %v2175_v61 = vmul.f32 %v2174_v60, %v3006_v19 }
0x16c1   : >> { %v2176_v62 = vadd.f32 1e-05, %v2175_v61 }
0x16c3   : >> { %2605 = vrsqrt.f32 %v2176_v62  ;;  %vm2183_vm14 = vweird.f32 %v2176_v62 }
0x16c9   : >> { %v2606_v51 = vpop.eup %2605 }
0x16ca   : >> { %v2178_v3 = vmul.f32 %v2606_v51, %v2176_v62  ;;  %vm2184_vm13 = vweird.f32 %v2606_v51 }
0x16cb   : >> { %vm2185_vm15 = vmor %vm2183_vm14, %vm2184_vm13 }
0x16cc   : >> { %v2179_v8 = vmul.f32 %v2606_v51, %v2178_v3 }
0x16ce   : >> { %v2180_v10 = vmul.f32 0.5, %v2179_v8 }
0x16d0   : >> { %v2181_v11 = vsub.f32 1.5, %v2180_v10 }
0x16d2   : >> { %v2182_v12 = vmul.f32 %v2606_v51, %v2181_v11 }
0x16d4   : >> { %v2186_v13 = vsel %vm2185_vm15, %v2606_v51, %v2182_v12 }
0x16d5   : >> { %v2187_v16 = vmul.f32 %v2186_v13, %v2170_v57 }
0x16d7   : >> { %v2189_v20 = vmul.f32 %v2188_v7, %v2187_v16  ;;  %1240 = sbr.rel (!%p1238_p12) target bundleno = 2678 (0xa76), region = 172 }
0x16d9   : >> { %v2191_v21 = vadd.f32 %v2190_v15, %v2189_v20  }
0x16db   : >> { %v3412_v34 = vmov %v2191_v21  ;;  %v2192_v22 = vsel (%p1238_p12), %vm664_vm1, %v2191_v21, 0.0 }
0x16dc   : > { %2193 = vadd.xlane.f32.xlu0 %v2192_v22 }
0x174f   : > { %v2194_v9 = vpop.xlane.xlu0 %2193 }
0x1750   : > { %v2195_v23 = vmul.f32 %v2194_v9, %v3006_v19 }
0x1752   : > { %v2196_v14 = vsub.f32 %v2191_v21, %v2195_v23 }
0x1754   : > { %v2197_v25 = vmul.f32 %v2196_v14, %v2196_v14 }
0x1756   : > { %v2198_v18 = vsel %vm664_vm1, %v2197_v25, 0.0 }
0x1757   : > { %2199 = vadd.xlane.f32.xlu0 %v2198_v18 }
0x17ca   : > { %v2200_v27 = vpop.xlane.xlu0 %2199 }
0x17cb   : > { %v2201_v28 = vmul.f32 %v2200_v27, %v3006_v19  ;;  %v2216_v19 = vperm.slane %v2920_v4, 5 }
0x17cd   : > { %v2202_v30 = vadd.f32 1e-05, %v2201_v28 }
0x17cf   : > { %2607 = vrsqrt.f32 %v2202_v30  ;;  %vm2209_vm2 = vweird.f32 %v2202_v30 }
0x17d5   : > { %v2608_v31 = vpop.eup %2607 }
0x17d6   : > { %v2204_v32 = vmul.f32 %v2608_v31, %v2202_v30  ;;  %vm2210_vm0 = vweird.f32 %v2608_v31 }
0x17d7   : > { %vm2211_vm6 = vmor %vm2209_vm2, %vm2210_vm0 }
0x17d8   : > { %v2205_v0 = vmul.f32 %v2608_v31, %v2204_v32 }
0x17da   : > { %v2206_v63 = vmul.f32 0.5, %v2205_v0 }
0x17dc   : > { %v2207_v1 = vsub.f32 1.5, %v2206_v63 }
0x17de   : > { %v2208_v2 = vmul.f32 %v2608_v31, %v2207_v1 }
0x17e0   : > { %v2212_v33 = vsel %vm2211_vm6, %v2608_v31, %v2208_v2 }
0x17e1   : > { %v2213_v36 = vmul.f32 %v2212_v33, %v2196_v14 }
0x17e3   : > { %v2215_v37 = vmul.f32 %v2214_v35, %v2213_v36 }
0x17e5   : > { %v2217_v38 = vadd.f32 %v2216_v19, %v2215_v37 }
0x17e7   : > { %2439 = vmatmul.msk.f32.vlgmr.msra.gmra.mxu0 %vm664_vm1, %v2217_v38 }
0x1864   : > { %v2243_v17 = vpop.f32.mrf.mxu0 }
0x1865   : > { %v2244_v40 = vadd.f32 %v2243_v17, %v2222_v39 }
0x1867   : > { %2247 = vst.msk [vmem:[%s3419_s3] sm:$0xff] %vm2246_vm11, %v2244_v40 }
0x1868   : > { %2636 = shalt.err (!%p2633_p7)
}
0x1869   : > { %2444 = dma.vmem_to_hbm [thread:$0]  (%p2873_p5), %s2262_s28, 128, %s2264_s19, %s2249_s29  }
0x186a PF: > { %s3421_s25 = sld [smem:[#allocation8_spill]] }
0x186b   : > { %s3422_s23 = sld [smem:[#allocation5_spill]] }
0x1870   : > { %p2450_p8 = scmp.ge.s32.totalorder %s3421_s25, 2 }
0x1871   : > { %s2275_s3 = sand.u32 1, %s3422_s23  }
0x1872   : > { %p2447_p9 = pnand %p2450_p8, %p2877_p6  ;;  %s2276_s27 = scalar_lea.sflag [#allocation3], %s2275_s3 }
0x1874   : > { %p2448_p10 = pneg %p2447_p9 }
0x1876   : > { %2670 = dma.done.wait (%p2448_p10), %s2276_s27, 128  }
0x1877   : > { %2672 = vsyncadd (%p2448_p10), %s2276_s27, 4294967168  ;;  %s3424_s21 = sld [smem:[#allocation9_spill]] }
0x1878   : > { %s3425_s0 = sld [smem:[#allocation6_spill]] }
0x1879   : > { %s3426_s30 = sld [smem:[#allocation7_spill]] }
0x187a   : > { %s3427_s20 = sld [smem:[#allocation10_spill]] }
0x187d   : > { %p29_p11 = scmp.ge.s32.totalorder %s3424_s21, 4  }
0x187f   :  { %31 = sbr.rel (!%p29_p11) target bundleno = 10 (0xa), region = 183 }
0x1884   :  { %2282 = vsyncpa [#allocation3], 1 }
0x1885   :  { %2284 = vsyncpa [#allocation3 + $0x1], 1 }

</bundles_post_ra>
